<compile_context>
chip_gen: v7x
topology: tpu7x:2x2x1
jax: 0.10.0
libtpu: 0.0.40
codegen_flags: <defaults>
</compile_context>

<pallas_src>
import jax
import jax.numpy as jnp
from jax.experimental import pallas as pl
from jax.experimental.pallas import tpu as pltpu


_INV_SQRT2 = 0.7071067811865476  # keep the GELU constant in f32


def _gelu_exact(x):
    # nn.GELU() default is the exact (erf-based) GELU.
    return 0.5 * x * (1.0 + jax.lax.erf(x * _INV_SQRT2))


def _round_up(n, m):
    return ((n + m - 1) // m) * m


def mlp_kernel(x_ref, w1_ref, b1_ref, w2_ref, b2_ref, o_ref, acc_ref):
    h_idx = pl.program_id(1)

    @pl.when(h_idx == 0)
    def _():
        # Seed the accumulator with b2 -> fc2 bias folded into the reduction.
        acc_ref[...] = jnp.broadcast_to(
            b2_ref[...].astype(jnp.float32), acc_ref.shape)

    # fc1 slice: [tm, K](bf16) @ [K, th](bf16) -> f32 accumulation on the MXU.
    h = jnp.dot(x_ref[...], w1_ref[...], preferred_element_type=jnp.float32)
    h = h + b1_ref[...].astype(jnp.float32)
    # Exact GELU in f32 (erf on the EUP); matches torch.nn.GELU default.
    h = _gelu_exact(h)
    # fc2 slice: [tm, th](bf16) @ [th, N](bf16), accumulated in f32.
    acc_ref[...] += jnp.dot(h.astype(w2_ref.dtype), w2_ref[...],
                            preferred_element_type=jnp.float32)

    @pl.when(h_idx == pl.num_programs(1) - 1)
    def _():
        o_ref[...] = acc_ref[...].astype(o_ref.dtype)


def mlp_pallas(x, w1, b1, w2, b2, *, tm=512, th=None, out_dtype=None):
    M, K = x.shape
    H = w1.shape[1]
    N = w2.shape[1]
    assert w1.shape == (K, H) and w2.shape == (H, N)
    assert b1.shape == (1, H) and b2.shape == (1, N)
    out_dtype = out_dtype or x.dtype

    # bf16 operands for the MXU; biases stay f32.
    xb = x.astype(jnp.bfloat16)
    w1b = w1.astype(jnp.bfloat16)
    w2b = w2.astype(jnp.bfloat16)
    b1f = b1.astype(jnp.float32)
    b2f = b2.astype(jnp.float32)

    # Row tile: multiple of 8 (sublanes).  Force >= 2 M-steps when possible so
    # dimension_semantics=("parallel", ...) actually shards across v7x's 2 TCs.
    tm = max(8, min(tm, _round_up(M, 8)))
    if pl.cdiv(M, tm) < 2 and M >= 16:
        tm = _round_up((M + 1) // 2, 8)
    m_steps = pl.cdiv(M, tm)  # ragged last M block is safe (rows independent,
                              # OOB output rows masked on store).

    # Hidden-reduction tile: must divide H exactly (a ragged reduction block
    # would feed garbage into the accumulator); prefer multiples of 128.
    if th is None:
        th = H
        for cand in (1024, 512, 256, 128):
            if H >= cand and H % cand == 0:
                th = cand
                break
    assert H % th == 0, "hidden tile size must divide hidden_features"
    h_steps = H // th

    # VMEM budget for this buffering scheme, clamped to the chip's capacity.
    bf16, f32 = 2, 4
    out_bytes = jnp.dtype(out_dtype).itemsize
    vmem_bytes = (
        2 * tm * K * bf16          # x row tile (double-buffered)
        + 2 * K * th * bf16        # w1 hidden slice (double-buffered)
        + 2 * th * f32             # b1 hidden slice
        + 2 * th * N * bf16        # w2 hidden slice (double-buffered)
        + 2 * N * f32              # b2
        + 2 * tm * N * out_bytes   # output tile (double-buffered)
        + tm * N * f32             # f32 accumulator scratch
        + 3 * tm * th * f32        # hidden intermediate + erf/GELU temporaries
        + (4 << 20)                # headroom
    )
    vmem_bytes = max(int(vmem_bytes), 16 << 20)
    try:
        cap = int(pltpu.get_tpu_info().vmem_capacity_bytes)
    except Exception:
        cap = 64 << 20  # conservative (v7x per-core)
    vmem_bytes = min(vmem_bytes, cap - (2 << 20))

    cost = pl.CostEstimate(
        flops=2 * M * (K * H + H * N),
        transcendentals=M * H,
        bytes_accessed=(M * K + K * H + H * N) * bf16
        + (H + N) * f32 + M * N * out_bytes,
    )

    return pl.pallas_call(
        mlp_kernel,
        out_shape=jax.ShapeDtypeStruct((M, N), out_dtype),
        grid_spec=pltpu.PrefetchScalarGridSpec(
            num_scalar_prefetch=0,
            grid=(m_steps, h_steps),
            in_specs=[
                pl.BlockSpec((tm, K), lambda i, h: (i, 0)),   # x row tile
                pl.BlockSpec((K, th), lambda i, h: (0, h)),   # w1 hidden slice
                pl.BlockSpec((1, th), lambda i, h: (0, h)),   # b1 hidden slice
                pl.BlockSpec((th, N), lambda i, h: (h, 0)),   # w2 hidden slice
                pl.BlockSpec((1, N), lambda i, h: (0, 0)),    # b2
            ],
            out_specs=pl.BlockSpec((tm, N), lambda i, h: (i, 0)),
            scratch_shapes=[pltpu.VMEM((tm, N), jnp.float32)],
        ),
        compiler_params=pltpu.CompilerParams(
            dimension_semantics=("parallel", "arbitrary"),
            vmem_limit_bytes=int(vmem_bytes),
        ),
        cost_estimate=cost,
    )(xb, w1b, b1f, w2b, b2f)


def mlp_reference_f32(x, w1, b1, w2, b2):
    h = x @ w1 + b1
    h = _gelu_exact(h)
    return h @ w2 + b2


def mlp_reference_bf16_ops(x, w1, b1, w2, b2):
    # Mimics the kernel's bf16 operand casts with f32 accumulation.
    f = lambda a: a.astype(jnp.bfloat16).astype(jnp.float32)
    h = f(x) @ f(w1) + b1
    h = _gelu_exact(h)
    return f(h) @ f(w2) + b2


if __name__ == "__main__":
    # Small, lane-dense shapes (feature dims multiples of 128); batch is not a
    # multiple of the row tile (exercises the ragged last M block) and hidden
    # spans two reduction steps (exercises the accumulator init/finalize path).
    batch = 300
    in_features = 128
    hidden_features = 512
    out_features = 128

    key = jax.random.PRNGKey(0)
    kx, kw1, kb1, kw2, kb2 = jax.random.split(key, 5)

    x = jax.random.normal(kx, (batch, in_features), dtype=jnp.float32)

    lim1 = 1.0 / float(jnp.sqrt(in_features))
    lim2 = 1.0 / float(jnp.sqrt(hidden_features))
    w1 = jax.random.uniform(kw1, (in_features, hidden_features), jnp.float32, -lim1, lim1)
    b1 = jax.random.uniform(kb1, (1, hidden_features), jnp.float32, -lim1, lim1)
    w2 = jax.random.uniform(kw2, (hidden_features, out_features), jnp.float32, -lim2, lim2)
    b2 = jax.random.uniform(kb2, (1, out_features), jnp.float32, -lim2, lim2)

    out = mlp_pallas(x, w1, b1, w2, b2)
    out = jax.block_until_ready(out)
    assert out.shape == (batch, out_features)

    # Tight check against a reference using the same bf16 operand casts.
    ref_bf = mlp_reference_bf16_ops(x, w1, b1, w2, b2)
    assert jnp.allclose(out, ref_bf, atol=2e-3, rtol=2e-3)

    # Loose sanity check against the full-f32 reference (bf16-level tolerance).
    ref_f32 = mlp_reference_f32(x, w1, b1, w2, b2)
    assert jnp.allclose(out, ref_f32, atol=5e-2, rtol=5e-2)

    print("KERNEL_OK")
</pallas_src>

<mosaic_0001>
module attributes {stable_mosaic.version = 11 : i64} {
  func.func @mlp_kernel(%arg0: i32, %arg1: i32, %arg2: memref<152x128xbf16, #tpu.memory_space<vmem>>, %arg3: memref<128x512xbf16, #tpu.memory_space<vmem>>, %arg4: memref<1x512xf32, #tpu.memory_space<vmem>>, %arg5: memref<512x128xbf16, #tpu.memory_space<vmem>>, %arg6: memref<1x128xf32, #tpu.memory_space<vmem>>, %arg7: memref<152x128xf32, #tpu.memory_space<vmem>>, %arg8: memref<152x128xf32, #tpu.memory_space<vmem>>) attributes {dimension_semantics = [#tpu.dimension_semantics<parallel>, #tpu.dimension_semantics<arbitrary>], iteration_bounds = array<i64: 2, 1>, scalar_prefetch = 0 : i64, scratch_operands = 1 : i64, tpu.core_type = #tpu.core_type<tc>, window_params = [{transform_indices = @transform_0, window_bounds = array<i64: 152, 128>}, {transform_indices = @transform_1, window_bounds = array<i64: 128, 512>}, {transform_indices = @transform_2, window_bounds = array<i64: 1, 512>}, {transform_indices = @transform_3, window_bounds = array<i64: 512, 128>}, {pipeline_mode = #tpu.pipeline_mode<synchronous>, transform_indices = @transform_4, window_bounds = array<i64: 1, 128>}, {transform_indices = @transform_5, window_bounds = array<i64: 152, 128>}]} {
    %c0_i32 = arith.constant 0 : i32
    %0 = arith.cmpi eq, %arg1, %c0_i32 : i32
    %1 = arith.extui %0 : i1 to i32
    %c0_i32_0 = arith.constant 0 : i32
    %2 = arith.cmpi ne, %1, %c0_i32_0 : i32
    scf.if %2 {
      %c0_18 = arith.constant 0 : index
      %c0_19 = arith.constant 0 : index
      %26 = vector.load %arg6[%c0_18, %c0_19] : memref<1x128xf32, #tpu.memory_space<vmem>>, vector<1x128xf32>
      %27 = vector.shape_cast %26 : vector<1x128xf32> to vector<1x128xf32>
      %28 = vector.broadcast %27 : vector<1x128xf32> to vector<152x128xf32>
      %c0_20 = arith.constant 0 : index
      %c0_21 = arith.constant 0 : index
      %29 = vector.load %arg8[%c0_20, %c0_21] : memref<152x128xf32, #tpu.memory_space<vmem>>, vector<152x128xf32>
      tpu.vector_store %arg8[%c0_20, %c0_21], %28 {strides = array<i32>} : memref<152x128xf32, #tpu.memory_space<vmem>>, vector<152x128xf32>,
    } else {
    }
    %c0 = arith.constant 0 : index
    %c0_1 = arith.constant 0 : index
    %3 = vector.load %arg2[%c0, %c0_1] : memref<152x128xbf16, #tpu.memory_space<vmem>>, vector<152x128xbf16>
    %c0_2 = arith.constant 0 : index
    %c0_3 = arith.constant 0 : index
    %4 = vector.load %arg3[%c0_2, %c0_3] : memref<128x512xbf16, #tpu.memory_space<vmem>>, vector<128x512xbf16>
    %cst = arith.constant dense<0.000000e+00> : vector<152x512xf32>
    %5 = tpu.matmul %3, %4, %cst {dimension_numbers = #tpu.dot_dimension_numbers<[1], [0], [0], [1], [0, 0, 1, 1], [], []>} : vector<152x128xbf16>, vector<128x512xbf16>, vector<152x512xf32> -> vector<152x512xf32>
    %c0_4 = arith.constant 0 : index
    %c0_5 = arith.constant 0 : index
    %6 = vector.load %arg4[%c0_4, %c0_5] : memref<1x512xf32, #tpu.memory_space<vmem>>, vector<1x512xf32>
    %7 = vector.broadcast %6 : vector<1x512xf32> to vector<152x512xf32>
    %8 = arith.addf %5, %7 : vector<152x512xf32>
    %cst_6 = arith.constant 5.000000e-01 : f32
    %9 = vector.broadcast %cst_6 : f32 to vector<152x512xf32>
    %10 = arith.mulf %9, %8 : vector<152x512xf32>
    %cst_7 = arith.constant 0.707106769 : f32
    %11 = vector.broadcast %cst_7 : f32 to vector<152x512xf32>
    %12 = arith.mulf %8, %11 : vector<152x512xf32>
    %13 = math.erf %12 : vector<152x512xf32>
    %cst_8 = arith.constant 1.000000e+00 : f32
    %14 = vector.broadcast %cst_8 : f32 to vector<152x512xf32>
    %15 = arith.addf %14, %13 : vector<152x512xf32>
    %16 = arith.mulf %10, %15 : vector<152x512xf32>
    %c0_9 = arith.constant 0 : index
    %c0_10 = arith.constant 0 : index
    %17 = vector.load %arg8[%c0_9, %c0_10] : memref<152x128xf32, #tpu.memory_space<vmem>>, vector<152x128xf32>
    %18 = arith.truncf %16 : vector<152x512xf32> to vector<152x512xbf16>
    %c0_11 = arith.constant 0 : index
    %c0_12 = arith.constant 0 : index
    %19 = vector.load %arg5[%c0_11, %c0_12] : memref<512x128xbf16, #tpu.memory_space<vmem>>, vector<512x128xbf16>
    %cst_13 = arith.constant dense<0.000000e+00> : vector<152x128xf32>
    %20 = tpu.matmul %18, %19, %cst_13 {dimension_numbers = #tpu.dot_dimension_numbers<[1], [0], [0], [1], [0, 0, 1, 1], [], []>} : vector<152x512xbf16>, vector<512x128xbf16>, vector<152x128xf32> -> vector<152x128xf32>
    %21 = arith.addf %17, %20 : vector<152x128xf32>
    %c0_14 = arith.constant 0 : index
    %c0_15 = arith.constant 0 : index
    %22 = vector.load %arg8[%c0_14, %c0_15] : memref<152x128xf32, #tpu.memory_space<vmem>>, vector<152x128xf32>
    tpu.vector_store %arg8[%c0_14, %c0_15], %21 {strides = array<i32>} : memref<152x128xf32, #tpu.memory_space<vmem>>, vector<152x128xf32>,
    %c0_i32_16 = arith.constant 0 : i32
    %23 = arith.cmpi eq, %arg1, %c0_i32_16 : i32
    %24 = arith.extui %23 : i1 to i32
    %c0_i32_17 = arith.constant 0 : i32
    %25 = arith.cmpi ne, %24, %c0_i32_17 : i32
    scf.if %25 {
      %c0_18 = arith.constant 0 : index
      %c0_19 = arith.constant 0 : index
      %26 = vector.load %arg8[%c0_18, %c0_19] : memref<152x128xf32, #tpu.memory_space<vmem>>, vector<152x128xf32>
      %c0_20 = arith.constant 0 : index
      %c0_21 = arith.constant 0 : index
      %27 = vector.load %arg7[%c0_20, %c0_21] : memref<152x128xf32, #tpu.memory_space<vmem>>, vector<152x128xf32>
      tpu.vector_store %arg7[%c0_20, %c0_21], %26 {strides = array<i32>} : memref<152x128xf32, #tpu.memory_space<vmem>>, vector<152x128xf32>,
    } else {
    }
    return
  }
  func.func @transform_0(%arg0: i32, %arg1: i32) -> (i32, i32) {
    %c0_i32 = arith.constant 0 : i32
    %c0_i32_0 = arith.constant 0 : i32
    return %arg0, %c0_i32 : i32, i32
  }
  func.func @transform_1(%arg0: i32, %arg1: i32) -> (i32, i32) {
    %c0_i32 = arith.constant 0 : i32
    %c0_i32_0 = arith.constant 0 : i32
    return %c0_i32, %arg1 : i32, i32
  }
  func.func @transform_2(%arg0: i32, %arg1: i32) -> (i32, i32) {
    %c0_i32 = arith.constant 0 : i32
    %c0_i32_0 = arith.constant 0 : i32
    return %c0_i32, %arg1 : i32, i32
  }
  func.func @transform_3(%arg0: i32, %arg1: i32) -> (i32, i32) {
    %c0_i32 = arith.constant 0 : i32
    %c0_i32_0 = arith.constant 0 : i32
    return %arg1, %c0_i32 : i32, i32
  }
  func.func @transform_4(%arg0: i32, %arg1: i32) -> (i32, i32) {
    %c0_i32 = arith.constant 0 : i32
    %c0_i32_0 = arith.constant 0 : i32
    %c0_i32_1 = arith.constant 0 : i32
    return %c0_i32, %c0_i32_0 : i32, i32
  }
  func.func @transform_5(%arg0: i32, %arg1: i32) -> (i32, i32) {
    %c0_i32 = arith.constant 0 : i32
    %c0_i32_0 = arith.constant 0 : i32
    return %arg0, %c0_i32 : i32, i32
  }
}

</mosaic_0001>

<bundles_post_ra>
// kernel: tpu_custom_call.1
= control target key start
LH: loop header
LB: loop body
LE: loop exit
PB: predicated region body
PF: predicated region fallthrough
CT: control target
= control target key end

     0   :  { %10 = vsyncpa [#allocation4], 0  ;;  %s3815_s0 = inlined_call_operand.hbm [shape: bf16[300,128], index: 0, kind: input, shape index: {}]   ;;  %s3816_s1 = inlined_call_operand.hbm [shape: bf16[128,512], index: 1, kind: input, shape index: {}]   ;;  %s3817_s2 = inlined_call_operand.vmem [shape: f32[1,512], index: 2, kind: input, shape index: {}]   ;;  %s3818_s3 = inlined_call_operand.hbm [shape: bf16[512,128], index: 3, kind: input, shape index: {}]   ;;  %s3819_s4 = inlined_call_operand.vmem [shape: f32[1,128], index: 4, kind: input, shape index: {}]   ;;  %s3820_s5 = inlined_call_operand.hbm [shape: f32[300,128], index: 5, kind: output, shape index: {}]  }
   0x1   :  { %12 = vsyncpa [#allocation4 + $0x1], 0 }
   0x2   :  { %13 = vsyncpa [#allocation7], 0 }
   0x3   :  { %14 = vsyncpa [#allocation5], 0 }
   0x4   :  { %16 = vsyncpa [#allocation5 + $0x1], 0  ;;  %s2828_s18 = smov 0   ;;  %s2830_s19 = smov 0  }
   0x5   :  { %s2832_s20 = smov 0   ;;  %s2834_s21 = smov 0  }
   0x6   :  { %s2836_s22 = smov 0   ;;  %s2838_s23 = smov 0  }
   0x7 LB: > { %s2035_s24 = sadd.s32 4294967295, %s2785_s23   ;;  %s2036_s25 = sadd.s32 4294967294, %s2785_s23   ;;  %s2785_s23 = sphi %s2838_s23, %s22_s23   ;;  %s2781_s22 = sphi %s2836_s22, %s3874_s22   ;;  %s2777_s21 = sphi %s2834_s21, %s3873_s21   ;;  %s2773_s20 = sphi %s2832_s20, %s3872_s20   ;;  %s2769_s19 = sphi %s2830_s19, %s3871_s19   ;;  %s2765_s18 = sphi %s2828_s18, %s3870_s18  }
   0x8   : > { %p54_p0 = scmp.ne.s32.totalorder %s2769_s19, %s2765_s18  ;;  %p2862_p1 = scmp.eq.s32.totalorder %s2035_s24, 0 }
   0x9   : > { %p2866_p2 = scmp.eq.s32.totalorder %s2035_s24, 1  ;;  %p183_p3 = scmp.eq.s32.totalorder %s2036_s25, 1 }
   0xa   : > { %s3827_s26 = scalar_select %p2862_p1, 1, 0 }
   0xb   : > { %p2872_p4 = por %p2862_p1, %p54_p0  ;;  %p2037_p5 = scmp.ge.s32.totalorder %s2785_s23, 1 }
   0xc   : > { %p2877_p6 = por %p183_p3, %p54_p0  ;;  %p190_p7 = scmp.lt.s32.totalorder %s2785_s23, 3 }
   0xd   : > { %s3829_s28 = scalar_select %p2872_p4, 1, 0 }
   0xe   : > { %s3830_s29 = scalar_select %p2877_p6, 1, 0 }
   0xf   : > { %p2882_p8 = pnand %p2037_p5, %p190_p7  ;;  %s2787_s6 = smov [#allocation6]  }
  0x10   : > { %s205_s7 = sshll.u32 %s2787_s6, 4  ;;  %s2788_s9 = smov [#allocation8]   ;;  %s2886_s7 = int_to_ptr.vmem [resolvable:$true] %s205_s7 }
  0x11   : > { %p2293_p9 = pneg %p2882_p8  ;;  %s229_s10 = sshll.u32 %s2788_s9, 4  ;;  %s2897_s10 = int_to_ptr.vmem [resolvable:$true] %s229_s10 }
  0x12   : > { %s2613_s13 = scalar_lea.hbm %s3816_s1, 4096 }
  0x13   : > { %p2893_p11 = pnand %p2293_p9, %p2862_p1  ;;  %p2614_p12 = scmp.ne.s32.totalorder %s3816_s1, %s2613_s13 }
  0x14   : > { %p2620_p5 = scmp.lt.u32.totalorder %s2613_s13, %s3816_s1 }
  0x15   : > { %p2615_p13 = pneg %p2893_p11 }
  0x17   : > { %p2616_p0 = pnand %p2615_p13, %p2614_p12 }
  0x19   : > { %p2617_p3 = pneg %p2616_p0 }
  0x1b   : > { %p2622_p7 = pnand %p2620_p5, %p2617_p3 }
  0x1d   : > { %2625 = shalt.err (!%p2622_p7)
}
  0x1e   : > { %s2626_s24 = scalar_lea.vmem %s2886_s7, 4096  ;;  %p2634_p1 = scmp.lt.s32.totalorder %s2886_s7, %s2886_s7 }
  0x1f   : > { %p2627_p9 = scmp.ne.s32.totalorder %s2886_s7, %s2626_s24  ;;  %p2635_p12 = scmp.lt.s32.totalorder %s2626_s24, %s2626_s24 }
  0x21   : > { %p2629_p10 = pnand %p2627_p9, %p2615_p13  ;;  %p2636_p0 = por %p2635_p12, %p2634_p1 }
  0x23   : > { %p2630_p6 = pneg %p2629_p10 }
  0x25   : > { %p2637_p4 = pnand %p2636_p0, %p2630_p6 }
  0x27   : > { %2640 = shalt.err (!%p2637_p4)
}
  0x28   : > { %s2789_s25 = smov 256   ;;  %s2790_s6 = smov 16  }
  0x29   : > { %2296 = dma.hbm_to_vmem [thread:$0]  (!%p2893_p11), %s3816_s1, 4096, %s2886_s7, [#allocation7], %s2789_s25, %s2789_s25, %s2790_s6  }
  0x2a   : > { %s2641_s14 = scalar_lea.hbm %s3818_s3, 4096 }
  0x2b   : > { %p2642_p1 = scmp.ne.s32.totalorder %s3818_s3, %s2641_s14  ;;  %p2648_p10 = scmp.lt.u32.totalorder %s2641_s14, %s3818_s3 }
  0x2d   : > { %p2644_p4 = pnand %p2642_p1, %p2615_p13 }
  0x2f   : > { %p2645_p6 = pneg %p2644_p4 }
  0x31   : > { %p2650_p3 = pnand %p2648_p10, %p2645_p6 }
  0x33   : > { %2653 = shalt.err (!%p2650_p3)
}
  0x34   : > { %s2654_s7 = scalar_lea.vmem %s2897_s10, 4096  ;;  %p2662_p12 = scmp.lt.s32.totalorder %s2897_s10, %s2897_s10 }
  0x35   : > { %p2655_p5 = scmp.ne.s32.totalorder %s2897_s10, %s2654_s7  ;;  %p2663_p0 = scmp.lt.s32.totalorder %s2654_s7, %s2654_s7 }
  0x37   : > { %p2657_p7 = pnand %p2655_p5, %p2615_p13  ;;  %p2664_p1 = por %p2663_p0, %p2662_p12 }
  0x39   : > { %p2658_p9 = pneg %p2657_p7 }
  0x3b   : > { %p2665_p4 = pnand %p2664_p1, %p2658_p9 }
  0x3d   : > { %2668 = shalt.err (!%p2665_p4)
}
  0x3e   : > { %s3824_s25 = smov 64   ;;  %s3825_s6 = smov 4  }
  0x3f   : > { %2299 = dma.hbm_to_vmem [thread:$0]  (!%p2893_p11), %s3818_s3, 4096, %s2897_s10, [#allocation7], %s3824_s25, %s3824_s25, %s3825_s6  }
  0x40   : > { %s34_s12 = sadd.s32 1, %s2781_s22  ;;  %s41_s13 = sadd.s32 1, %s2773_s20 }
  0x41   : > { %p36_p13 = scmp.ge.s32.totalorder %s34_s12, 2  ;;  %p48_p6 = scmp.ne.s32.totalorder %s2773_s20, %s2769_s19 }
  0x42   : > { %p49_p10 = scmp.eq.s32.totalorder %s2785_s23, 0  ;;  %p2310_p3 = scmp.lt.s32.totalorder %s2785_s23, 2 }
  0x43   : > { %s3876_s12 = smov (%p36_p13, %s34_s12), 0  ;;  %p2964_p7 = por %p2866_p2, %p48_p6 }
  0x44   : > { %p50_p5 = por %p49_p10, %p48_p6  ;;  %s38_s14 = ssub.s32 %s2781_s22, %s3876_s12 }
  0x45   : > { %s3833_s8 = scalar_select %p2964_p7, 1, 0 }
  0x46   : > { %s246_s15 = sand.u32 1, %s2773_s20   ;;  %p39_p9 = scmp.eq.s32.totalorder %s38_s14, 0 }
  0x47   : > { %s2278_s10 = smul.u32 76, %s246_s15  ;;  %p2971_p11 = pnand %p2310_p3, %p50_p5 }
  0x48   : > { %s2976_s17 = scalar_select %p39_p9, %s2773_s20, %s41_s13  }
  0x49   : > { %s2124_s24 = smul.u32 1216, %s2781_s22  ;;  %s250_s7 = scalar_lea.vmem [#allocation3], %s2278_s10 }
  0x4a   : > { %s257_s9 = sshll.u32 %s250_s7, 4  ;;  %s2986_s14 = scalar_lea.sflag [#allocation4], %s246_s15  ;;  %s2984_s9 = int_to_ptr.vmem [resolvable:$true] %s257_s9 }
  0x4b   : > { %s2982_s25 = scalar_lea.hbm %s3815_s0, %s2124_s24  ;;  %p2671_p12 = pneg %p2971_p11 }
  0x4c   : > { %s2669_s6 = scalar_lea.hbm %s2982_s25, 1216  ;;  %s2674_s24 = scalar_lea.hbm %s3815_s0, 2432 }
  0x4d   : > { %p2670_p2 = scmp.ne.s32.totalorder %s2982_s25, %s2669_s6  ;;  %p2675_p4 = scmp.lt.u32.totalorder %s2982_s25, %s3815_s0 }
  0x4e   : > { %p2676_p13 = scmp.lt.u32.totalorder %s2674_s24, %s2669_s6  ;;  %p2678_p10 = scmp.lt.u32.totalorder %s2669_s6, %s2982_s25 }
  0x4f   : > { %p2672_p0 = pnand %p2671_p12, %p2670_p2 }
  0x50   : > { %p2677_p6 = por %p2676_p13, %p2675_p4 }
  0x51   : > { %p2673_p1 = pneg %p2672_p0 }
  0x52   : > { %p2679_p3 = por %p2678_p10, %p2677_p6 }
  0x54   : > { %p2680_p5 = pnand %p2679_p3, %p2673_p1 }
  0x56   : > { %2683 = shalt.err (!%p2680_p5)
}
  0x57   : > { %s2684_s15 = scalar_lea.vmem %s2984_s9, 1216  ;;  %s2793_s11 = smov [#allocation3]  }
  0x58   : > { %p2685_p9 = scmp.ne.s32.totalorder %s2984_s9, %s2684_s15  ;;  %s2689_s13 = sshll.u32 %s2793_s11, 4  ;;  %s2690_s13 = int_to_ptr.vmem [resolvable:$false] %s2689_s13 }
  0x59   : > { %s2691_s10 = scalar_lea.vmem %s2690_s13, 2432  ;;  %p2692_p7 = scmp.lt.s32.totalorder %s2984_s9, %s2690_s13 }
  0x5a   : > { %p2687_p2 = pnand %p2685_p9, %p2671_p12  ;;  %p2693_p4 = scmp.lt.s32.totalorder %s2691_s10, %s2684_s15 }
  0x5c   : > { %p2688_p0 = pneg %p2687_p2  ;;  %p2694_p13 = por %p2693_p4, %p2692_p7 }
  0x5e   : > { %p2695_p6 = pnand %p2694_p13, %p2688_p0 }
  0x60   : > { %2698 = shalt.err (!%p2695_p6)
}
  0x61   : > { %s3835_s6 = smov 4   ;;  %s3836_s24 = smov 64  }
  0x62   : > { %2303 = dma.hbm_to_vmem [thread:$0]  (!%p2971_p11), %s2982_s25, 1216, %s2984_s9, %s2986_s14, %s3836_s24, %s3836_s24, %s3835_s6  }
  0x63   : > { %269 = sbr.rel (%p2882_p8) target bundleno = 735 (0x2df), region = 40 }
  0x6a   : > { %s3020_s7 = sand.u32 1, %s2769_s19   ;;  %p3837_p7 = scmp.ne.s32.totalorder %s3829_s28, 0 }
  0x6b   : > { %s2279_s27 = smul.u32 76, %s3020_s7  ;;  %s272_s15 = scalar_lea.sflag [#allocation4], %s3020_s7 }
  0x6d   : > { %s3024_s11 = scalar_lea.vmem [#allocation3], %s2279_s27 }
  0x6e   : > { %2752 = dma.done.wait (%p3837_p7), %s272_s15, 1216  }
  0x6f   : > { %2754 = vsyncadd (%p3837_p7), %s272_s15, 4294966080  ;;  %p3838_p11 = scmp.ne.s32.totalorder %s3827_s26, 0 }
  0x71   : > { %2756 = dma.done.wait (%p3838_p11), [#allocation7], 8192  }
  0x72   : > { %2758 = vsyncadd (%p3838_p11), [#allocation7], 4294959104  ;;  %v2794_v0 = vmov 0   ;;  %v2371_v1 = vld [vmem:[#allocation6 + $0x4] ss:$16 sps:$4 sm:$0xff]   ;;  %v2433_v38 = vld [vmem:[#allocation8 + $0x48] sm:$0xff]  }
  0x73   : > { %677 = vmatprep.mubr.bf16.mxu0 %v2794_v0  ;;  %808 = vmatprep.mubr.bf16.mxu1 %v2794_v0  ;;  %v2373_v2 = vld [vmem:[#allocation6 + $0xc] ss:$16 sps:$4 sm:$0xff]   ;;  %v2375_v3 = vld [vmem:[#allocation6] ss:$16 sps:$4 sm:$0xff]   ;;  %v2376_v4 = vld [vmem:[#allocation6 + $0x8] ss:$16 sps:$4 sm:$0xff]  }
  0x74   : > { %645 = vmatprep.subr.bf16.mxu0 %v2371_v1  ;;  %776 = vmatprep.subr.bf16.mxu1 %v2373_v2  ;;  %v2377_v5 = vld [vmem:[#allocation6 + $0x24] ss:$16 sps:$4 sm:$0xff]   ;;  %v2379_v6 = vld [vmem:[#allocation6 + $0x2c] ss:$16 sps:$4 sm:$0xff]   ;;  %v2381_v7 = vld [vmem:[#allocation6 + $0x20] ss:$16 sps:$4 sm:$0xff]  }
  0x75   : > { %646 = vmatpush1.bf16.msra.mxu0 %v2375_v3  ;;  %777 = vmatpush1.bf16.msra.mxu1 %v2376_v4  ;;  %v2382_v8 = vld [vmem:[#allocation6 + $0x28] ss:$16 sps:$4 sm:$0xff]   ;;  %v2383_v9 = vld [vmem:[#allocation6 + $0x44] ss:$16 sps:$4 sm:$0xff]   ;;  %v2385_v10 = vld [vmem:[#allocation6 + $0x4c] ss:$16 sps:$4 sm:$0xff]  }
  0x76   : > { %647 = vmatprep.subr.bf16.mxu0 %v2377_v5  ;;  %778 = vmatprep.subr.bf16.mxu1 %v2379_v6  ;;  %v2387_v11 = vld [vmem:[#allocation6 + $0x40] ss:$16 sps:$4 sm:$0xff]   ;;  %v2388_v12 = vld [vmem:[#allocation6 + $0x48] ss:$16 sps:$4 sm:$0xff]   ;;  %v2389_v13 = vld [vmem:[#allocation6 + $0x64] ss:$16 sps:$4 sm:$0xff]  }
  0x77   : > { %v2391_v14 = vld [vmem:[#allocation6 + $0x6c] ss:$16 sps:$4 sm:$0xff]   ;;  %v2393_v15 = vld [vmem:[#allocation6 + $0x60] ss:$16 sps:$4 sm:$0xff]   ;;  %v2394_v16 = vld [vmem:[#allocation6 + $0x68] ss:$16 sps:$4 sm:$0xff]  }
  0x78   : > { %v2395_v17 = vld [vmem:[#allocation6 + $0x84] ss:$16 sps:$4 sm:$0xff]   ;;  %v2397_v18 = vld [vmem:[#allocation6 + $0x8c] ss:$16 sps:$4 sm:$0xff]   ;;  %v2399_v19 = vld [vmem:[#allocation6 + $0x80] ss:$16 sps:$4 sm:$0xff]  }
  0x79   : > { %648 = vmatpush1.bf16.msra.mxu0 %v2381_v7  ;;  %779 = vmatpush1.bf16.msra.mxu1 %v2382_v8  ;;  %v2400_v20 = vld [vmem:[#allocation6 + $0x88] ss:$16 sps:$4 sm:$0xff]   ;;  %v2401_v21 = vld [vmem:[#allocation6 + $0xa4] ss:$16 sps:$4 sm:$0xff]   ;;  %v2403_v22 = vld [vmem:[#allocation6 + $0xac] ss:$16 sps:$4 sm:$0xff]  }
  0x7a   : > { %649 = vmatprep.subr.bf16.mxu0 %v2383_v9  ;;  %780 = vmatprep.subr.bf16.mxu1 %v2385_v10  ;;  %v2405_v23 = vld [vmem:[#allocation6 + $0xa0] ss:$16 sps:$4 sm:$0xff]   ;;  %v2406_v24 = vld [vmem:[#allocation6 + $0xa8] ss:$16 sps:$4 sm:$0xff]   ;;  %v2407_v25 = vld [vmem:[#allocation6 + $0xc4] ss:$16 sps:$4 sm:$0xff]  }
  0x7b   : > { %v2409_v26 = vld [vmem:[#allocation6 + $0xcc] ss:$16 sps:$4 sm:$0xff]   ;;  %v2411_v27 = vld [vmem:[#allocation6 + $0xc0] ss:$16 sps:$4 sm:$0xff]   ;;  %v2412_v28 = vld [vmem:[#allocation6 + $0xc8] ss:$16 sps:$4 sm:$0xff]  }
  0x7c   : > { %v2413_v29 = vld [vmem:[#allocation6 + $0xe4] ss:$16 sps:$4 sm:$0xff]   ;;  %v2415_v30 = vld [vmem:[#allocation6 + $0xec] ss:$16 sps:$4 sm:$0xff]   ;;  %v2417_v31 = vld [vmem:[#allocation6 + $0xe0] ss:$16 sps:$4 sm:$0xff]  }
  0x7d   : > { %650 = vmatpush1.bf16.msra.mxu0 %v2387_v11  ;;  %781 = vmatpush1.bf16.msra.mxu1 %v2388_v12  ;;  %v2418_v32 = vld [vmem:[#allocation6 + $0xe8] ss:$16 sps:$4 sm:$0xff]   ;;  %v2429_v34 = vld [vmem:[#allocation8 + $0x40] sm:$0xff]   ;;  %v2437_v43 = vld [vmem:[#allocation8 + $0x50] sm:$0xff]   ;;  %s2280_s30 = smul.u32 152, %s3020_s7  ;;  %p3867_p12 = scmp.ne.s32.totalorder %s3833_s8, 0 }
  0x7e   : > { %651 = vmatprep.subr.bf16.mxu0 %v2389_v13  ;;  %782 = vmatprep.subr.bf16.mxu1 %v2391_v14  ;;  %v2419_v33 = vld [vmem:[%s3024_s11] sm:$0xff]   ;;  %v2430_v35 = vld [vmem:[#allocation8 + $0xc0] sm:$0xff]   ;;  %v2428_v3 = vld [vmem:[%s3024_s11 + $0x48] ss:$0 sps:$4 sm:$0xff]   ;;  %s2125_s14 = smul.u32 2432, %s2777_s21  ;;  %s1906_s21 = scalar_lea.sflag [#allocation5], %s3020_s7 }
  0x7f   : > { %v2431_v36 = vld [vmem:[#allocation8] sm:$0xff]   ;;  %v2434_v39 = vld [vmem:[#allocation8 + $0xc8] sm:$0xff]   ;;  %v2438_v44 = vld [vmem:[#allocation8 + $0xd0] sm:$0xff]   ;;  %s3720_s9 = scalar_lea.vmem [#allocation9], %s2280_s30  ;;  %s2795_s15 = smov [#allocation9]  }
  0x80   : > { %v2432_v37 = vld [vmem:[#allocation8 + $0x80] sm:$0xff]   ;;  %v2435_v41 = vld [vmem:[#allocation8 + $0x8] sm:$0xff]   ;;  %v2439_v45 = vld [vmem:[#allocation8 + $0x10] sm:$0xff]   ;;  %s1919_s13 = sshll.u32 %s3720_s9, 4  ;;  %s3762_s24 = scalar_lea.hbm %s3820_s5, %s2125_s14  ;;  %s3765_s13 = int_to_ptr.vmem [resolvable:$true] %s1919_s13 }
  0x81   : > { %652 = vmatpush1.bf16.msra.mxu0 %v2393_v15  ;;  %783 = vmatpush1.bf16.msra.mxu1 %v2394_v16  ;;  %v2420_v40 = vld [vmem:[%s3024_s11 + $0x8] sm:$0xff]   ;;  %v2436_v42 = vld [vmem:[#allocation8 + $0x88] sm:$0xff]   ;;  %s2699_s27 = scalar_lea.vmem %s3765_s13, 2432 }
  0x82   : > { %653 = vmatprep.subr.bf16.mxu0 %v2395_v17  ;;  %784 = vmatprep.subr.bf16.mxu1 %v2397_v18  ;;  %v2440_v46 = vld [vmem:[#allocation8 + $0x90] sm:$0xff]   ;;  %v2441_v47 = vld [vmem:[#allocation8 + $0x58] sm:$0xff]   ;;  %v2445_v52 = vld [vmem:[#allocation8 + $0x60] sm:$0xff]   ;;  %p2700_p8 = scmp.ne.s32.totalorder %s3765_s13, %s2699_s27 }
  0x83   : > { %v2442_v48 = vld [vmem:[#allocation8 + $0xd8] sm:$0xff]   ;;  %v2446_v53 = vld [vmem:[#allocation8 + $0xe0] sm:$0xff]   ;;  %v2449_v56 = vld [vmem:[#allocation8 + $0x68] sm:$0xff]  }
  0x84   : > { %v2421_v49 = vld [vmem:[%s3024_s11 + $0x10] sm:$0xff]   ;;  %v2422_v60 = vld [vmem:[%s3024_s11 + $0x18] sm:$0xff]   ;;  %v2423_v61 = vld [vmem:[%s3024_s11 + $0x20] sm:$0xff]   ;;  %p2701_p1 = pnand %p2700_p8, %p3867_p12 }
  0x85   : > { %654 = vmatpush1.bf16.msra.mxu0 %v2399_v19  ;;  %785 = vmatpush1.bf16.msra.mxu1 %v2400_v20  ;;  %v2443_v50 = vld [vmem:[#allocation8 + $0x18] sm:$0xff]   ;;  %v2447_v54 = vld [vmem:[#allocation8 + $0x20] sm:$0xff]   ;;  %v2450_v57 = vld [vmem:[#allocation8 + $0xe8] sm:$0xff]  }
  0x86   : > { %655 = vmatprep.subr.bf16.mxu0 %v2401_v21  ;;  %786 = vmatprep.subr.bf16.mxu1 %v2403_v22  ;;  %v2444_v51 = vld [vmem:[#allocation8 + $0x98] sm:$0xff]   ;;  %v2448_v55 = vld [vmem:[#allocation8 + $0xa0] sm:$0xff]   ;;  %v2451_v58 = vld [vmem:[#allocation8 + $0x28] sm:$0xff]   ;;  %p2702_p10 = pneg %p2701_p1 }
  0x87   : > { %v2452_v59 = vld [vmem:[#allocation8 + $0xa8] sm:$0xff]   ;;  %v2424_v62 = vld [vmem:[%s3024_s11 + $0x28] sm:$0xff]  }
  0x88   : > { %v2425_v63 = vld [vmem:[%s3024_s11 + $0x30] sm:$0xff]   ;;  %v2426_v1 = vld [vmem:[%s3024_s11 + $0x38] sm:$0xff]   ;;  %v2427_v2 = vld [vmem:[%s3024_s11 + $0x40] sm:$0xff]   ;;  %s2703_s11 = sshll.u32 %s2795_s15, 4  ;;  %s2704_s11 = int_to_ptr.vmem [resolvable:$false] %s2703_s11 }
  0x89   : > { %656 = vmatpush1.bf16.msra.mxu0 %v2405_v23  ;;  %787 = vmatpush1.bf16.msra.mxu1 %v2406_v24  ;;  %v2453_v4 = vld [vmem:[#allocation8 + $0x70] sm:$0xff]   ;;  %v2457_v8 = vld [vmem:[#allocation8 + $0x78] sm:$0xff]   ;;  %v405_v15 = vld [vmem:[%s3817_s2] sm:$0xf]  ;;  %s2705_s26 = scalar_lea.vmem %s2704_s11, 4864  ;;  %p2706_p3 = scmp.lt.s32.totalorder %s3765_s13, %s2704_s11 }
  0x8a   : > { %657 = vmatprep.subr.bf16.mxu0 %v2407_v25  ;;  %788 = vmatprep.subr.bf16.mxu1 %v2409_v26  ;;  %v2454_v5 = vld [vmem:[#allocation8 + $0xf0] sm:$0xff]   ;;  %v2458_v9 = vld [vmem:[#allocation8 + $0xf8] sm:$0xff]   ;;  %p2707_p5 = scmp.lt.s32.totalorder %s2705_s26, %s2699_s27 }
  0x8b   : > { %v2455_v6 = vld [vmem:[#allocation8 + $0x30] sm:$0xff]   ;;  %v2459_v10 = vld [vmem:[#allocation8 + $0x38] sm:$0xff]  }
  0x8c   : > { %v2456_v7 = vld [vmem:[#allocation8 + $0xb0] sm:$0xff]   ;;  %v2460_v11 = vld [vmem:[#allocation8 + $0xb8] sm:$0xff]   ;;  %p2708_p9 = por %p2707_p5, %p2706_p3 }
  0x8d   : > { %658 = vmatpush1.bf16.msra.mxu0 %v2411_v27  ;;  %789 = vmatpush1.bf16.msra.mxu1 %v2412_v28 }
  0x8e   : > { %659 = vmatprep.subr.bf16.mxu0 %v2413_v29  ;;  %790 = vmatprep.subr.bf16.mxu1 %v2415_v30  ;;  %p2709_p2 = pnand %p2708_p9, %p2702_p10 }
  0x91   : > { %660 = vmatpush1.bf16.msra.mxu0 %v2417_v31  ;;  %791 = vmatpush1.bf16.msra.mxu1 %v2418_v32 }
  0x92   : > { %2126 = vmatprep.subr.bf16.mxu0 %v2429_v34  ;;  %2202 = vmatprep.subr.bf16.mxu1 %v2430_v35 }
  0x94   : > { %678 = vmatmul.mubr.bf16.vlgmr.msra.gmra.mrb[0].mxu0 %v2419_v33  ;;  %809 = vmatmul.mubr.bf16.vlgmr.msra.gmra.mrb[0].mxu1 %v2419_v33 }
  0x95   : > { %687 = vmatprep.mubr.bf16.mxu0 %v2794_v0  ;;  %818 = vmatprep.mubr.bf16.mxu1 %v2794_v0 }
  0x96   : > { %2127 = vmatpush3.bf16.msra.mxu0 %v2431_v36  ;;  %2203 = vmatpush3.bf16.msra.mxu1 %v2432_v37 }
  0x97   : > { %2128 = vmatprep.subr.bf16.mxu0 %v2433_v38  ;;  %2204 = vmatprep.subr.bf16.mxu1 %v2434_v39 }
  0x9a   : > { %2129 = vmatpush3.bf16.msra.mxu0 %v2435_v41  ;;  %2205 = vmatpush3.bf16.msra.mxu1 %v2436_v42 }
  0x9b   : > { %2130 = vmatprep.subr.bf16.mxu0 %v2437_v43  ;;  %2206 = vmatprep.subr.bf16.mxu1 %v2438_v44 }
  0x9c   : > { %688 = vmatmul.mubr.bf16.gmra.mrb[4].mxu0 %v2420_v40  ;;  %819 = vmatmul.mubr.bf16.gmra.mrb[4].mxu1 %v2420_v40 }
  0x9d   : > { %697 = vmatprep.mubr.bf16.mxu0 %v2794_v0  ;;  %828 = vmatprep.mubr.bf16.mxu1 %v2794_v0 }
  0x9e   : > { %2131 = vmatpush3.bf16.msra.mxu0 %v2439_v45  ;;  %2207 = vmatpush3.bf16.msra.mxu1 %v2440_v46 }
  0x9f   : > { %2132 = vmatprep.subr.bf16.mxu0 %v2441_v47  ;;  %2208 = vmatprep.subr.bf16.mxu1 %v2442_v48 }
  0xa2   : > { %2133 = vmatpush3.bf16.msra.mxu0 %v2443_v50  ;;  %2209 = vmatpush3.bf16.msra.mxu1 %v2444_v51 }
  0xa3   : > { %2134 = vmatprep.subr.bf16.mxu0 %v2445_v52  ;;  %2210 = vmatprep.subr.bf16.mxu1 %v2446_v53 }
  0xa4   : > { %698 = vmatmul.mubr.bf16.gmra.mrb[8].mxu0 %v2421_v49  ;;  %829 = vmatmul.mubr.bf16.gmra.mrb[8].mxu1 %v2421_v49 }
  0xa5   : > { %707 = vmatprep.mubr.bf16.mxu0 %v2794_v0  ;;  %838 = vmatprep.mubr.bf16.mxu1 %v2794_v0 }
  0xa6   : > { %2135 = vmatpush3.bf16.msra.mxu0 %v2447_v54  ;;  %2211 = vmatpush3.bf16.msra.mxu1 %v2448_v55 }
  0xa7   : > { %2136 = vmatprep.subr.bf16.mxu0 %v2449_v56  ;;  %2212 = vmatprep.subr.bf16.mxu1 %v2450_v57 }
  0xaa   : > { %2137 = vmatpush3.bf16.msra.mxu0 %v2451_v58  ;;  %2213 = vmatpush3.bf16.msra.mxu1 %v2452_v59 }
  0xab   : > { %2138 = vmatprep.subr.bf16.mxu0 %v2453_v4  ;;  %2214 = vmatprep.subr.bf16.mxu1 %v2454_v5 }
  0xac   : > { %708 = vmatmul.mubr.bf16.gmra.mrb[12].mxu0 %v2422_v60  ;;  %839 = vmatmul.mubr.bf16.gmra.mrb[12].mxu1 %v2422_v60 }
  0xad   : > { %717 = vmatprep.mubr.bf16.mxu0 %v2794_v0  ;;  %848 = vmatprep.mubr.bf16.mxu1 %v2794_v0 }
  0xae   : > { %2139 = vmatpush3.bf16.msra.mxu0 %v2455_v6  ;;  %2215 = vmatpush3.bf16.msra.mxu1 %v2456_v7 }
  0xaf   : > { %2140 = vmatprep.subr.bf16.mxu0 %v2457_v8  ;;  %2216 = vmatprep.subr.bf16.mxu1 %v2458_v9 }
  0xb2   : > { %2141 = vmatpush3.bf16.msra.mxu0 %v2459_v10  ;;  %2217 = vmatpush3.bf16.msra.mxu1 %v2460_v11 }
  0xb4   : > { %718 = vmatmul.mubr.bf16.gmra.mrb[16].mxu0 %v2423_v61  ;;  %849 = vmatmul.mubr.bf16.gmra.mrb[16].mxu1 %v2423_v61 }
  0xb5   : > { %727 = vmatprep.mubr.bf16.mxu0 %v2794_v0  ;;  %858 = vmatprep.mubr.bf16.mxu1 %v2794_v0 }
  0xbc   : > { %728 = vmatmul.mubr.bf16.gmra.mrb[20].mxu0 %v2424_v62  ;;  %859 = vmatmul.mubr.bf16.gmra.mrb[20].mxu1 %v2424_v62 }
  0xbd   : > { %737 = vmatprep.mubr.bf16.mxu0 %v2794_v0  ;;  %868 = vmatprep.mubr.bf16.mxu1 %v2794_v0 }
  0xc4   : > { %738 = vmatmul.mubr.bf16.gmra.mrb[24].mxu0 %v2425_v63  ;;  %869 = vmatmul.mubr.bf16.gmra.mrb[24].mxu1 %v2425_v63 }
  0xc5   : > { %747 = vmatprep.mubr.bf16.mxu0 %v2794_v0  ;;  %878 = vmatprep.mubr.bf16.mxu1 %v2794_v0 }
  0xcc   : > { %748 = vmatmul.mubr.bf16.gmra.mrb[28].mxu0 %v2426_v1  ;;  %879 = vmatmul.mubr.bf16.gmra.mrb[28].mxu1 %v2426_v1 }
  0xcd   : > { %757 = vmatprep.mubr.bf16.mxu0 %v2794_v0  ;;  %888 = vmatprep.mubr.bf16.mxu1 %v2794_v0 }
  0xd4   : > { %758 = vmatmul.mubr.bf16.gmra.mrb[32].mxu0 %v2427_v2  ;;  %889 = vmatmul.mubr.bf16.gmra.mrb[32].mxu1 %v2427_v2 }
  0xd5   : > { %767 = vmatprep.mubr.bf16.mxu0 %v2794_v0  ;;  %898 = vmatprep.mubr.bf16.mxu1 %v2794_v0  ;;  %v407_v0 = vlaneseq }
  0xd7   : > { %v408_v12 = vshrl.u32 %v407_v0, 7 }
  0xd9   : > { %v409_v13 = vsub.s32 0, %v408_v12  ;;  %v417_v14 = vsub.s32 2, %v408_v12  ;;  %v413_v16 = vsub.s32 1, %v408_v12  ;;  %v421_v17 = vsub.s32 3, %v408_v12 }
  0xdb   : > { %v3067_v18 = vrot.slane %v405_v15, %v409_v13  ;;  %v3069_v19 = vrot.slane %v405_v15, %v417_v14  ;;  %v3071_v20 = vrot.slane %v405_v15, %v413_v16  ;;  %v3073_v23 = vrot.slane %v405_v15, %v421_v17 }
  0xdc   : > { %768 = vmatmul.mubr.bf16.gmra.mrb[36].mxu0 %v2428_v3  ;;  %899 = vmatmul.mubr.bf16.gmra.mrb[36].mxu1 %v2428_v3 }
 0x167   : > { %v679_v21 = vpop.f32.mrb[0].mxu0  ;;  %v810_v22 = vpop.f32.mrb[0].mxu1 }
 0x168   : > { %v680_v24 = vadd.f32 %v679_v21, %v3067_v18  ;;  %v811_v25 = vadd.f32 %v810_v22, %v3069_v19  ;;  %v681_v26 = vpop.f32.mrb[1].mxu0  ;;  %v812_v27 = vpop.f32.mrb[1].mxu1 }
 0x169   : > { %v682_v28 = vadd.f32 %v681_v26, %v3071_v20  ;;  %v683_v29 = vpop.f32.mrb[2].mxu0  ;;  %v814_v30 = vpop.f32.mrb[2].mxu1  ;;  %v813_v34 = vadd.f32 %v812_v27, %v3073_v23 }
 0x16a   : > { %v983_v31 = vmul.f32 0.70710677, %v680_v24  ;;  %v985_v32 = vmul.f32 0.70710677, %v811_v25  ;;  %v684_v35 = vadd.f32 %v683_v29, %v3067_v18  ;;  %v815_v36 = vadd.f32 %v814_v30, %v3069_v19  ;;  %v685_v37 = vpop.f32.mrb[3].mxu0  ;;  %v816_v38 = vpop.f32.mrb[3].mxu1 }
 0x16b   : > { %v984_v33 = vmul.f32 0.70710677, %v682_v28  ;;  %v686_v39 = vadd.f32 %v685_v37, %v3071_v20  ;;  %v817_v41 = vadd.f32 %v816_v38, %v3073_v23  ;;  %v986_v42 = vmul.f32 0.70710677, %v813_v34 }
 0x16c   : > { %2461 = verf.f32 %v983_v31  ;;  %v987_v40 = vmul.f32 0.70710677, %v684_v35  ;;  %v989_v43 = vmul.f32 0.70710677, %v815_v36  ;;  %v907_v60 = vmul.f32 0.5, %v680_v24 }
 0x16d   : > { %2463 = verf.f32 %v985_v32  ;;  %v988_v45 = vmul.f32 0.70710677, %v686_v39  ;;  %v990_v53 = vmul.f32 0.70710677, %v817_v41  ;;  %v909_v1 = vmul.f32 0.5, %v811_v25 }
 0x16e   : > { %2465 = verf.f32 %v984_v33  ;;  %v3088_v2 = vmul.f32 0.5, %v682_v28  ;;  %v3091_v5 = vmul.f32 0.5, %v813_v34  ;;  %v911_v6 = vmul.f32 0.5, %v684_v35 }
 0x16f   : > { %v689_v44 = vpop.f32.mrb[4].mxu0  ;;  %2467 = verf.f32 %v987_v40  ;;  %v820_v47 = vpop.f32.mrb[4].mxu1  ;;  %v913_v7 = vmul.f32 0.5, %v815_v36  ;;  %v3093_v11 = vmul.f32 0.5, %v686_v39  ;;  %v3095_v14 = vmul.f32 0.5, %v817_v41 }
 0x170   : > { %v690_v46 = vadd.f32 %v689_v44, %v3067_v18  ;;  %v691_v48 = vpop.f32.mrb[5].mxu0  ;;  %2469 = verf.f32 %v989_v43  ;;  %v821_v49 = vadd.f32 %v820_v47, %v3069_v19  ;;  %v822_v51 = vpop.f32.mrb[5].mxu1 }
 0x171   : > { %v692_v50 = vadd.f32 %v691_v48, %v3071_v20  ;;  %v693_v52 = vpop.f32.mrb[6].mxu0  ;;  %v824_v54 = vpop.f32.mrb[6].mxu1  ;;  %2471 = verf.f32 %v986_v42  ;;  %v823_v59 = vadd.f32 %v822_v51, %v3073_v23 }
 0x172   : > { %v695_v55 = vpop.f32.mrb[7].mxu0  ;;  %v991_v56 = vmul.f32 0.70710677, %v690_v46  ;;  %v826_v57 = vpop.f32.mrb[7].mxu1  ;;  %2473 = verf.f32 %v988_v45  ;;  %v993_v58 = vmul.f32 0.70710677, %v821_v49  ;;  %v694_v62 = vadd.f32 %v693_v52, %v3067_v18 }
 0x173   : > { %v992_v61 = vmul.f32 0.70710677, %v692_v50  ;;  %2475 = verf.f32 %v990_v53  ;;  %v825_v3 = vadd.f32 %v824_v54, %v3069_v19  ;;  %v994_v0 = vmul.f32 0.70710677, %v823_v59 }
 0x174   : > { %2477 = verf.f32 %v991_v56  ;;  %v995_v15 = vmul.f32 0.70710677, %v694_v62  ;;  %v696_v16 = vadd.f32 %v695_v55, %v3071_v20  ;;  %v3098_v25 = vmul.f32 0.5, %v690_v46 }
 0x175   : > { %2479 = verf.f32 %v993_v58  ;;  %v997_v26 = vmul.f32 0.70710677, %v825_v3  ;;  %v3102_v31 = vmul.f32 0.5, %v821_v49  ;;  %v3104_v32 = vmul.f32 0.5, %v692_v50 }
 0x176   : > { %v2462_v63 = vpop.eup %2461  ;;  %2481 = verf.f32 %v992_v61  ;;  %v827_v33 = vadd.f32 %v826_v57, %v3073_v23  ;;  %v996_v41 = vmul.f32 0.70710677, %v696_v16  ;;  %v3121_v47 = vmul.f32 0.5, %v823_v59 }
 0x177   : > { %v2464_v4 = vpop.eup %2463  ;;  %v699_v8 = vpop.f32.mrb[8].mxu0  ;;  %v1135_v10 = vadd.f32 1.0, %v2462_v63  ;;  %2483 = verf.f32 %v994_v0  ;;  %v3128_v55 = vmul.f32 0.5, %v694_v62  ;;  %v3134_v61 = vmul.f32 0.5, %v825_v3 }
 0x178   : > { %v830_v9 = vpop.f32.mrb[8].mxu1  ;;  %v701_v12 = vpop.f32.mrb[9].mxu0  ;;  %v1137_v24 = vadd.f32 1.0, %v2464_v4  ;;  %v700_v37 = vadd.f32 %v699_v8, %v3067_v18  ;;  %2485 = verf.f32 %v995_v15  ;;  %v998_v48 = vmul.f32 0.70710677, %v827_v33 }
 0x179   : > { %v2466_v13 = vpop.eup %2465  ;;  %v832_v17 = vpop.f32.mrb[9].mxu1  ;;  %v3109_v35 = vmul.f32 %v1135_v10, %v907_v60  ;;  %2487 = verf.f32 %v997_v26  ;;  %v831_v45 = vadd.f32 %v830_v9, %v3069_v19  ;;  %v702_v49 = vadd.f32 %v701_v12, %v3071_v20 }
 0x17a   : > { %v703_v21 = vpop.f32.mrb[10].mxu0  ;;  %v2468_v22 = vpop.eup %2467  ;;  %v1136_v39 = vadd.f32 1.0, %v2466_v13  ;;  %v3114_v43 = vmul.f32 %v1137_v24, %v909_v1  ;;  %v999_v56 = vmul.f32 0.70710677, %v700_v37  ;;  %v3136_v63 = vmul.f32 0.5, %v696_v16 }
 0x17b   : > { %v834_v27 = vpop.f32.mrb[10].mxu1  ;;  %v3100_v28 = vpop.f32.mrb[11].mxu0  ;;  %v1139_v30 = vadd.f32 1.0, %v2468_v22  ;;  %2489 = verf.f32 %v996_v41  ;;  %v1001_v8 = vmul.f32 0.70710677, %v831_v45  ;;  %v833_v9 = vadd.f32 %v832_v17, %v3073_v23 }
 0x17c   : > { %v2470_v29 = vpop.eup %2469  ;;  %v3107_v34 = vpop.f32.mrb[11].mxu1  ;;  %v3143_v62 = vmul.f32 %v1136_v39, %v3088_v2  ;;  %2491 = verf.f32 %v998_v48  ;;  %v1000_v12 = vmul.f32 0.70710677, %v702_v49  ;;  %v704_v13 = vadd.f32 %v703_v21, %v3067_v18 }
 0x17d   : > { %v1141_v36 = vadd.f32 1.0, %v2470_v29  ;;  %v2472_v38 = vpop.eup %2471  ;;  %v3112_v40 = vmul.f32 %v1139_v30, %v911_v6  ;;  %v835_v15 = vadd.f32 %v834_v27, %v3069_v19  ;;  %2493 = verf.f32 %v999_v56 }
 0x17e   : > { %v2474_v42 = vpop.eup %2473  ;;  %v1138_v53 = vadd.f32 1.0, %v2472_v38  ;;  %v3156_v26 = vmul.f32 0.5, %v700_v37  ;;  %v1002_v17 = vmul.f32 0.70710677, %v833_v9  ;;  %v1003_v29 = vmul.f32 0.70710677, %v704_v13 }
 0x17f   : > { %v3116_v44 = vmul.f32 %v1141_v36, %v913_v7  ;;  %v1306_v46 = vpack.c.bf16 %v3112_v40, %v3109_v35  ;;  %v709_v50 = vpop.f32.mrb[12].mxu0  ;;  %v3124_v51 = vpop.f32.mrb[12].mxu1  ;;  %v1140_v60 = vadd.f32 1.0, %v2474_v42  ;;  %v3145_v7 = vmul.f32 0.5, %v827_v33 }
 0x180   : > { %v2476_v52 = vpop.eup %2475  ;;  %v3130_v57 = vpop.f32.mrb[13].mxu0  ;;  %v1214_v16 = vmul.f32 %v1138_v53, %v3091_v5  ;;  %v3158_v38 = vmul.f32 0.5, %v831_v45  ;;  %2495 = verf.f32 %v1001_v8  ;;  %v1005_v27 = vmul.f32 0.70710677, %v835_v15 }
 0x181   : > { %v1308_v54 = vpack.c.bf16 %v3116_v44, %v3114_v43  ;;  %v3132_v58 = vpop.f32.mrb[13].mxu1  ;;  %v2478_v59 = vpop.eup %2477  ;;  %v1142_v2 = vadd.f32 1.0, %v2476_v52  ;;  %v1216_v24 = vmul.f32 %v1140_v60, %v3093_v11  ;;  %2497 = verf.f32 %v1000_v12 }
 0x182   : > { %v3138_v1 = vpop.f32.mrb[14].mxu0  ;;  %v3140_v4 = vpop.f32.mrb[14].mxu1  ;;  %v1143_v22 = vadd.f32 1.0, %v2478_v59  ;;  %v3162_v5 = vadd.f32 %v3100_v28, %v3071_v20  ;;  %v3166_v11 = vadd.f32 %v3107_v34, %v3073_v23  ;;  %2499 = verf.f32 %v1002_v17 }
 0x183   : > { %v2480_v6 = vpop.eup %2479  ;;  %v3148_v10 = vpop.f32.mrb[15].mxu0  ;;  %v1218_v42 = vmul.f32 %v1142_v2, %v3095_v14  ;;  %v3177_v48 = vadd.f32 %v709_v50, %v3067_v18  ;;  %v3183_v53 = vmul.f32 0.5, %v702_v49  ;;  %2501 = verf.f32 %v1003_v29 }
 0x184   : > { %v3150_v3 = vpop.f32.mrb[15].mxu1  ;;  %v2482_v0 = vpop.eup %2481  ;;  %v1145_v33 = vadd.f32 1.0, %v2480_v6  ;;  %v3174_v45 = vmul.f32 %v1143_v22, %v3098_v25  ;;  %v1004_v56 = vmul.f32 0.70710677, %v3162_v5  ;;  %v1006_v6 = vmul.f32 0.70710677, %v3166_v11 }
 0x185   : > { %v2484_v30 = vpop.eup %2483  ;;  %v1144_v36 = vadd.f32 1.0, %v2482_v0  ;;  %2503 = verf.f32 %v1005_v27  ;;  %v3201_v12 = vadd.f32 %v3124_v51, %v3069_v19  ;;  %v3205_v2 = vadd.f32 %v3130_v57, %v3071_v20 }
 0x186   : > { %v2486_v21 = vpop.eup %2485  ;;  %v1146_v34 = vadd.f32 1.0, %v2484_v30  ;;  %v3191_v25 = vmul.f32 %v1145_v33, %v3102_v31  ;;  %v3212_v22 = vadd.f32 %v3132_v58, %v3073_v23  ;;  %v1307_v17 = vpack.c.bf16 %v1216_v24, %v3143_v62 }
 0x187   : > { %v3168_v37 = vpop.f32.mrb[16].mxu0  ;;  %v3170_v39 = vpop.f32.mrb[16].mxu1  ;;  %v3194_v50 = vmul.f32 %v1144_v36, %v3104_v32  ;;  %v1147_v60 = vadd.f32 1.0, %v2486_v21  ;;  %v1007_v32 = vmul.f32 0.70710677, %v3177_v48  ;;  %v1309_v29 = vpack.c.bf16 %v1218_v42, %v1214_v16 }
 0x188   : > { %v2488_v41 = vpop.eup %2487  ;;  %v3179_v28 = vpop.f32.mrb[17].mxu0  ;;  %v3216_v33 = vmul.f32 %v1146_v34, %v3121_v47  ;;  %v3218_v51 = vmul.f32 0.5, %v833_v9  ;;  %2505 = verf.f32 %v1004_v56  ;;  %v1009_v57 = vmul.f32 0.70710677, %v3201_v12  ;;  %1634 = vmatprep.mubr.bf16.mxu0 %v1307_v17 }
 0x189   : > { %v3181_v52 = vpop.f32.mrb[17].mxu1  ;;  %v3186_v59 = vpop.f32.mrb[18].mxu0  ;;  %v1149_v0 = vadd.f32 1.0, %v2488_v41  ;;  %v3221_v27 = vmul.f32 0.5, %v704_v13  ;;  %2507 = verf.f32 %v1006_v6  ;;  %v1008_v58 = vmul.f32 0.70710677, %v3205_v2  ;;  %1746 = vmatprep.mubr.bf16.mxu1 %v1309_v29  ;;  %1635 = vmatmul.mubr.bf16.vlgmr.msra.gmra.mrb[40].mxu0 %v1306_v46 }
 0x18a   : > { %v3188_v14 = vpop.f32.mrb[18].mxu1  ;;  %v3197_v8 = vpop.f32.mrb[19].mxu0  ;;  %v3225_v62 = vmul.f32 %v1147_v60, %v3128_v55  ;;  %v3227_v16 = vmul.f32 0.5, %v835_v15  ;;  %v1010_v47 = vmul.f32 0.70710677, %v3212_v22  ;;  %v714_v9 = vadd.f32 %v3138_v1, %v3067_v18  ;;  %1747 = vmatmul.mubr.bf16.vlgmr.msra.gmra.mrb[40].mxu1 %v1308_v54 }
 0x18b   : > { %v2490_v49 = vpop.eup %2489  ;;  %v3207_v31 = vpop.f32.mrb[19].mxu1  ;;  %v3243_v15 = vmul.f32 %v1149_v0, %v3134_v61  ;;  %2509 = verf.f32 %v1007_v32  ;;  %v845_v1 = vadd.f32 %v3140_v4, %v3069_v19  ;;  %v716_v35 = vadd.f32 %v3148_v10, %v3071_v20 }
 0x18c   : > { %v2492_v30 = vpop.eup %2491  ;;  %v1148_v21 = vadd.f32 1.0, %v2490_v49  ;;  %2511 = verf.f32 %v1009_v57  ;;  %v1011_v41 = vmul.f32 0.70710677, %v714_v9  ;;  %v3261_v4 = vmul.f32 0.5, %v3162_v5 }
 0x18d   : > { %v2494_v36 = vpop.eup %2493  ;;  %v1150_v44 = vadd.f32 1.0, %v2492_v30  ;;  %2513 = verf.f32 %v1008_v58  ;;  %v1013_v10 = vmul.f32 0.70710677, %v845_v1  ;;  %v3266_v49 = vmul.f32 0.5, %v3166_v11 }
 0x18e   : > { %v2496_v55 = vpop.eup %2495  ;;  %v1151_v54 = vadd.f32 1.0, %v2494_v36  ;;  %v3258_v56 = vmul.f32 %v1148_v21, %v3136_v63  ;;  %2515 = verf.f32 %v1010_v47  ;;  %v1012_v0 = vmul.f32 0.70710677, %v716_v35 }
 0x18f   : > { %v3238_v13 = vpop.f32.mrb[20].mxu0  ;;  %v3240_v24 = vpop.f32.mrb[20].mxu1  ;;  %v847_v32 = vadd.f32 %v3150_v3, %v3073_v23  ;;  %v1153_v63 = vadd.f32 1.0, %v2496_v55  ;;  %2517 = verf.f32 %v1011_v41  ;;  %v720_v5 = vadd.f32 %v3168_v37, %v3067_v18 }
 0x190   : > { %v3249_v40 = vpop.f32.mrb[21].mxu0  ;;  %v3251_v46 = vpop.f32.mrb[21].mxu1  ;;  %v1226_v57 = vmul.f32 %v1150_v44, %v3145_v7  ;;  %v3276_v36 = vmul.f32 %v1151_v54, %v3156_v26  ;;  %v3279_v11 = vmul.f32 0.5, %v3177_v48  ;;  %2519 = verf.f32 %v1013_v10 }
 0x191   : > { %v2498_v43 = vpop.eup %2497  ;;  %v3253_v42 = vpop.f32.mrb[22].mxu0  ;;  %v3282_v58 = vmul.f32 0.5, %v3201_v12  ;;  %2521 = verf.f32 %v1012_v0  ;;  %v3285_v55 = vmul.f32 0.5, %v3205_v2  ;;  %v3288_v37 = vmul.f32 0.5, %v3212_v22 }
 0x192   : > { %v3255_v61 = vpop.f32.mrb[22].mxu1  ;;  %v2500_v34 = vpop.eup %2499  ;;  %v1152_v29 = vadd.f32 1.0, %v2498_v43  ;;  %v1014_v7 = vmul.f32 0.70710677, %v847_v32  ;;  %v851_v26 = vadd.f32 %v3170_v39, %v3069_v19  ;;  %v3297_v12 = vmul.f32 %v1153_v63, %v3158_v38 }
 0x193   : > { %v3263_v60 = vpop.f32.mrb[23].mxu0  ;;  %v2502_v6 = vpop.eup %2501  ;;  %v1154_v21 = vadd.f32 1.0, %v2500_v34  ;;  %v1015_v2 = vmul.f32 0.70710677, %v720_v5  ;;  %v722_v22 = vadd.f32 %v3179_v28, %v3071_v20  ;;  %v3308_v10 = vmul.f32 0.5, %v714_v9 }
 0x194   : > { %v3270_v17 = vpop.f32.mrb[23].mxu1  ;;  %v2504_v30 = vpop.eup %2503  ;;  %v1155_v3 = vadd.f32 1.0, %v2502_v6  ;;  %v3300_v54 = vmul.f32 %v1152_v29, %v3183_v53  ;;  %v3310_v6 = vmul.f32 0.5, %v845_v1  ;;  %v3314_v38 = vadd.f32 %v3181_v52, %v3073_v23 }
 0x195   : > { %v2506_v47 = vpop.eup %2505  ;;  %v1157_v39 = vadd.f32 1.0, %v2504_v30  ;;  %v3321_v28 = vmul.f32 %v1154_v21, %v3218_v51  ;;  %v3326_v9 = vmul.f32 0.5, %v716_v35  ;;  %2523 = verf.f32 %v1014_v7 }
 0x196   : > { %v2508_v44 = vpop.eup %2507  ;;  %v3324_v29 = vmul.f32 %v1155_v3, %v3221_v27  ;;  %v1156_v30 = vadd.f32 1.0, %v2506_v47  ;;  %v3334_v51 = vmul.f32 0.5, %v847_v32  ;;  %2525 = verf.f32 %v1015_v2 }
 0x197   : > { %v3292_v48 = vpop.f32.mrb[24].mxu0  ;;  %v3294_v43 = vpop.f32.mrb[24].mxu1  ;;  %v1016_v27 = vmul.f32 0.70710677, %v722_v22  ;;  %v1313_v21 = vpack.c.bf16 %v1226_v57, %v3216_v33  ;;  %v3338_v3 = vmul.f32 %v1157_v39, %v3227_v16  ;;  %v1018_v47 = vmul.f32 0.70710677, %v3314_v38 }
 0x198   : > { %3839 = vst [vmem:[#allocation13_spill] sm:$0xff] %v3294_v43  ;;  %v3304_v41 = vpop.f32.mrb[25].mxu0  ;;  %v3306_v34 = vpop.f32.mrb[25].mxu1  ;;  %v724_v7 = vadd.f32 %v3186_v59, %v3067_v18  ;;  %v3346_v32 = vmul.f32 %v1156_v30, %v3261_v4  ;;  %v1310_v33 = vpack.c.bf16 %v3225_v62, %v3174_v45  ;;  %v1312_v16 = vpack.c.bf16 %v3243_v15, %v3191_v25 }
 0x199   : > { %3840 = vst [vmem:[#allocation14_spill] sm:$0xff] %v3304_v41  ;;  %3841 = vst [vmem:[#allocation15_spill] sm:$0xff] %v3306_v34  ;;  %v3316_v0 = vpop.f32.mrb[26].mxu0  ;;  %v3318_v53 = vpop.f32.mrb[26].mxu1  ;;  %v1158_v41 = vadd.f32 1.0, %v2508_v44  ;;  %v3348_v44 = vmul.f32 0.5, %v720_v5  ;;  %1754 = vmatprep.mubr.bf16.mxu1 %v1313_v21  ;;  %v726_v45 = vadd.f32 %v3197_v8, %v3071_v20 }
 0x19a   : > { %3842 = vst [vmem:[#allocation16_spill] sm:$0xff] %v3316_v0  ;;  %3843 = vst [vmem:[#allocation17_spill] sm:$0xff] %v3318_v53  ;;  %v2510_v63 = vpop.eup %2509  ;;  %v3328_v1 = vpop.f32.mrb[27].mxu0  ;;  %v1017_v0 = vmul.f32 0.70710677, %v851_v26  ;;  %v1311_v53 = vpack.c.bf16 %v3258_v56, %v3194_v50  ;;  %v855_v50 = vadd.f32 %v3188_v14, %v3069_v19  ;;  %1755 = vmatmul.mubr.bf16.gmra.mrb[44].mxu1 %v1312_v16 }
 0x19b   : > { %v3330_v34 = vpop.f32.mrb[27].mxu1  ;;  %v2512_v52 = vpop.eup %2511  ;;  %v3355_v2 = vmul.f32 %v1158_v41, %v3266_v49  ;;  %v1159_v59 = vadd.f32 1.0, %v2510_v63  ;;  %v1019_v14 = vmul.f32 0.70710677, %v724_v7  ;;  %v857_v41 = vadd.f32 %v3207_v31, %v3073_v23 }
 0x19c   : > { %v2514_v43 = vpop.eup %2513  ;;  %1642 = vmatprep.mubr.bf16.mxu0 %v1311_v53  ;;  %2527 = verf.f32 %v1017_v0  ;;  %v3359_v53 = vmul.f32 0.5, %v851_v26  ;;  %v1021_v5 = vmul.f32 0.70710677, %v855_v50  ;;  %v1161_v15 = vadd.f32 1.0, %v2512_v52 }
 0x19d   : > { %v2516_v35 = vpop.eup %2515  ;;  %2529 = verf.f32 %v1016_v27  ;;  %1643 = vmatmul.mubr.bf16.gmra.mrb[44].mxu0 %v1310_v33  ;;  %v1160_v49 = vadd.f32 1.0, %v2514_v43  ;;  %v3373_v27 = vmul.f32 0.5, %v722_v22  ;;  %v730_v43 = vadd.f32 %v3238_v13, %v3067_v18 }
 0x19e   : > { %v2518_v56 = vpop.eup %2517  ;;  %2531 = verf.f32 %v1018_v47  ;;  %v1162_v63 = vadd.f32 1.0, %v2516_v35  ;;  %v3382_v31 = vmul.f32 %v1159_v59, %v3279_v11  ;;  %v3385_v47 = vmul.f32 0.5, %v3314_v38 }
 0x19f   : > { %v2520_v57 = vpop.eup %2519  ;;  %v3357_v39 = vpop.f32.mrb[28].mxu0  ;;  %v1163_v30 = vadd.f32 1.0, %v2518_v56  ;;  %2533 = verf.f32 %v1019_v14  ;;  %v1020_v35 = vmul.f32 0.70710677, %v726_v45  ;;  %v3389_v22 = vadd.f32 %v3240_v24, %v3069_v19 }
 0x1a0   : > { %v2522_v4 = vpop.eup %2521  ;;  %v3363_v25 = vpop.f32.mrb[28].mxu1  ;;  %v1165_v33 = vadd.f32 1.0, %v2520_v57  ;;  %2535 = verf.f32 %v1021_v5  ;;  %v3394_v57 = vmul.f32 %v1161_v15, %v3282_v58  ;;  %v3397_v14 = vmul.f32 %v1160_v49, %v3285_v55 }
 0x1a1   : > { %v3365_v62 = vpop.f32.mrb[29].mxu0  ;;  %v3369_v0 = vpop.f32.mrb[29].mxu1  ;;  %v1164_v52 = vadd.f32 1.0, %v2522_v4  ;;  %v1022_v13 = vmul.f32 0.70710677, %v857_v41  ;;  %v3401_v11 = vadd.f32 %v3249_v40, %v3071_v20  ;;  %v3404_v59 = vmul.f32 %v1162_v63, %v3288_v37 }
 0x1a2   : > { %v3371_v26 = vpop.f32.mrb[30].mxu0  ;;  %v3375_v8 = vpop.f32.mrb[30].mxu1  ;;  %v3406_v24 = vmul.f32 0.5, %v724_v7  ;;  %v3408_v4 = vmul.f32 0.5, %v855_v50  ;;  %v3412_v58 = vadd.f32 %v3251_v46, %v3073_v23  ;;  %v3415_v55 = vmul.f32 %v1163_v30, %v3308_v10 }
 0x1a3   : > { %v3377_v21 = vpop.f32.mrb[31].mxu0  ;;  %v3391_v56 = vpop.f32.mrb[31].mxu1  ;;  %v3418_v5 = vmul.f32 %v1165_v33, %v3310_v6  ;;  %v3421_v40 = vmul.f32 %v1164_v52, %v3326_v9  ;;  %v1023_v15 = vmul.f32 0.70710677, %v730_v43  ;;  %v3427_v49 = vmul.f32 0.5, %v726_v45 }
 0x1a4   : > { %v2524_v16 = vpop.eup %2523  ;;  %2537 = verf.f32 %v1020_v35  ;;  %v1025_v46 = vmul.f32 0.70710677, %v3389_v22  ;;  %v1024_v9 = vmul.f32 0.70710677, %v3401_v11  ;;  %v1315_v33 = vpack.c.bf16 %v3346_v32, %v3300_v54 }
 0x1a5   : > { %v2526_v38 = vpop.eup %2525  ;;  %v1166_v50 = vadd.f32 1.0, %v2524_v16  ;;  %2539 = verf.f32 %v1022_v13  ;;  %v1026_v35 = vmul.f32 0.70710677, %v3412_v58  ;;  %v865_v13 = vadd.f32 %v3255_v61, %v3069_v19 }
 0x1a6   : > { %v2528_v6 = vpop.eup %2527  ;;  %v1167_v30 = vadd.f32 1.0, %v2526_v38  ;;  %2541 = verf.f32 %v1023_v15  ;;  %1650 = vmatprep.mubr.bf16.mxu0 %v1315_v33  ;;  %v1314_v32 = vpack.c.bf16 %v3324_v29, %v3276_v36  ;;  %v3461_v61 = vmul.f32 0.5, %v857_v41 }
 0x1a7   : > { %v3423_v37 = vpop.f32.mrb[32].mxu0  ;;  %v3425_v7 = vpop.f32.mrb[32].mxu1  ;;  %2543 = verf.f32 %v1025_v46  ;;  %v1169_v33 = vadd.f32 1.0, %v2528_v6  ;;  %v1029_v36 = vmul.f32 0.70710677, %v865_v13  ;;  %v740_v6 = vadd.f32 %v3292_v48, %v3067_v18 }
 0x1a8   : > { %3844 = vst [vmem:[#allocation18_spill] sm:$0xff] %v3425_v7  ;;  %v3430_v63 = vpop.f32.mrb[33].mxu0  ;;  %v3432_v10 = vpop.f32.mrb[33].mxu1  ;;  %2545 = verf.f32 %v1024_v9  ;;  %1651 = vmatmul.mubr.bf16.gmra.mrb[48].mxu0 %v1314_v32 }
 0x1a9   : > { %3845 = vst [vmem:[#allocation19_spill] sm:$0xff] %v3430_v63  ;;  %3846 = vst [vmem:[#allocation20_spill] sm:$0xff] %v3432_v10  ;;  %v3437_v52 = vpop.f32.mrb[34].mxu0  ;;  %v3439_v16 = vpop.f32.mrb[34].mxu1  ;;  %v1317_v63 = vpack.c.bf16 %v3355_v2, %v3321_v28  ;;  %v734_v10 = vadd.f32 %v3253_v42, %v3067_v18  ;;  %v736_v28 = vadd.f32 %v3263_v60, %v3071_v20  ;;  %2547 = verf.f32 %v1026_v35 }
 0x1aa   : > { %3847 = vst [vmem:[#allocation21_spill] sm:$0xff] %v3439_v16  ;;  %v2530_v45 = vpop.eup %2529  ;;  %v3448_v38 = vpop.f32.mrb[35].mxu0  ;;  %v1316_v16 = vpack.c.bf16 %v3338_v3, %v3297_v12  ;;  %v3459_v2 = vmul.f32 %v1166_v50, %v3334_v51  ;;  %v867_v60 = vadd.f32 %v3270_v17, %v3073_v23  ;;  %v3468_v51 = vmul.f32 %v1167_v30, %v3348_v44 }
 0x1ab   : > { %3848 = vst [vmem:[#allocation22_spill] sm:$0xff] %v3448_v38  ;;  %v3450_v7 = vpop.f32.mrb[35].mxu1  ;;  %v2532_v54 = vpop.eup %2531  ;;  %1762 = vmatprep.mubr.bf16.mxu1 %v1317_v63  ;;  %v3463_v38 = vmul.f32 0.5, %v730_v43  ;;  %v1168_v12 = vadd.f32 1.0, %v2530_v45  ;;  %v1028_v41 = vmul.f32 0.70710677, %v736_v28  ;;  %v3481_v17 = vmul.f32 %v1169_v33, %v3359_v53 }
 0x1ac   : > { %3849 = vst [vmem:[#allocation23_spill] sm:$0xff] %v3450_v7  ;;  %v2534_v42 = vpop.eup %2533  ;;  %v1027_v7 = vmul.f32 0.70710677, %v734_v10  ;;  %1763 = vmatmul.mubr.bf16.gmra.mrb[48].mxu1 %v1316_v16  ;;  %v1170_v29 = vadd.f32 1.0, %v2532_v54  ;;  %v1030_v63 = vmul.f32 0.70710677, %v867_v60 }
 0x1ad   : > { %v2536_v15 = vpop.eup %2535  ;;  %v1171_v3 = vadd.f32 1.0, %v2534_v42  ;;  %v3484_v44 = vmul.f32 0.5, %v3389_v22  ;;  %v3490_v30 = vmul.f32 0.5, %v3412_v58  ;;  %v3493_v48 = vmul.f32 %v1168_v12, %v3373_v27  ;;  %v3853_v53 = vld [vmem:[#allocation13_spill] sm:$0xff] }
 0x1ae   : > { %2549 = verf.f32 %v1027_v7  ;;  %v1173_v46 = vadd.f32 1.0, %v2536_v15  ;;  %v3487_v7 = vmul.f32 0.5, %v3401_v11  ;;  %v2538_v35 = vpop.eup %2537  ;;  %v3496_v54 = vmul.f32 %v1170_v29, %v3385_v47 }
 0x1af   : > { %v3470_v50 = vpop.f32.mrb[36].mxu0  ;;  %v3472_v43 = vpop.f32.mrb[36].mxu1  ;;  %2551 = verf.f32 %v1029_v36  ;;  %v3498_v32 = vmul.f32 0.5, %v734_v10  ;;  %v871_v22 = vadd.f32 %v3853_v53, %v3069_v19  ;;  %v3502_v33 = vmul.f32 0.5, %v865_v13  ;;  %v3854_v36 = vld [vmem:[#allocation14_spill] sm:$0xff]  ;;  %v3855_v13 = vld [vmem:[#allocation15_spill] sm:$0xff] }
 0x1b0   : > { %3850 = vst [vmem:[#allocation24_spill] sm:$0xff] %v3472_v43  ;;  %v3476_v9 = vpop.f32.mrb[37].mxu0  ;;  %v3478_v16 = vpop.f32.mrb[37].mxu1  ;;  %v3504_v58 = vmul.f32 0.5, %v736_v28  ;;  %2553 = verf.f32 %v1028_v41  ;;  %v742_v27 = vadd.f32 %v3854_v36, %v3071_v20  ;;  %v3509_v47 = vmul.f32 %v1171_v3, %v3406_v24 }
 0x1b1   : > { %3851 = vst [vmem:[#allocation25_spill] sm:$0xff] %v3476_v9  ;;  %3852 = vst [vmem:[#allocation26_spill] sm:$0xff] %v3478_v16  ;;  %v773_v45 = vpop.f32.mrb[38].mxu0  ;;  %v904_v42 = vpop.f32.mrb[38].mxu1  ;;  %v3512_v10 = vmul.f32 %v1173_v46, %v3408_v4  ;;  %2555 = verf.f32 %v1030_v63  ;;  %v1031_v29 = vmul.f32 0.70710677, %v740_v6  ;;  %v1319_v28 = vpack.c.bf16 %v3421_v40, %v3397_v14 }
 0x1b2   : > { %v774_v15 = vpop.f32.mrb[39].mxu0  ;;  %v2540_v11 = vpop.eup %2539  ;;  %v1172_v53 = vadd.f32 1.0, %v2538_v35  ;;  %v873_v42 = vadd.f32 %v3855_v13, %v3073_v23  ;;  %v1321_v41 = vpack.c.bf16 %v3459_v2, %v3404_v59  ;;  %v3520_v24 = vmul.f32 0.5, %v867_v60  ;;  %v3856_v4 = vld [vmem:[#allocation16_spill] sm:$0xff]  ;;  %v3857_v13 = vld [vmem:[#allocation17_spill] sm:$0xff] }
 0x1b3   : > { %v905_v12 = vpop.f32.mrb[39].mxu1  ;;  %v2542_v45 = vpop.eup %2541  ;;  %v1174_v36 = vadd.f32 1.0, %v2540_v11  ;;  %v1033_v3 = vmul.f32 0.70710677, %v871_v22  ;;  %v744_v46 = vadd.f32 %v3856_v4, %v3067_v18  ;;  %v1032_v35 = vmul.f32 0.70710677, %v742_v27  ;;  %1658 = vmatprep.mubr.bf16.mxu0 %v1319_v28 }
 0x1b4   : > { %v2544_v15 = vpop.eup %2543  ;;  %v3524_v12 = vmul.f32 0.5, %v740_v6  ;;  %1770 = vmatprep.mubr.bf16.mxu1 %v1321_v41  ;;  %v875_v14 = vadd.f32 %v3857_v13, %v3069_v19  ;;  %v1318_v59 = vpack.c.bf16 %v3415_v55, %v3382_v31  ;;  %v1175_v2 = vadd.f32 1.0, %v2542_v45 }
 0x1b5   : > { %v2546_v63 = vpop.eup %2545  ;;  %2557 = verf.f32 %v1031_v29  ;;  %v1034_v60 = vmul.f32 0.70710677, %v873_v42  ;;  %v1320_v11 = vpack.c.bf16 %v3418_v5, %v3394_v57  ;;  %v1248_v6 = vmul.f32 %v1172_v53, %v3427_v49 }
 0x1b6   : > { %v2548_v40 = vpop.eup %2547  ;;  %v1177_v16 = vadd.f32 1.0, %v2544_v15  ;;  %v3533_v9 = vmul.f32 0.5, %v871_v22  ;;  %v1035_v28 = vmul.f32 0.70710677, %v744_v46  ;;  %1659 = vmatmul.mubr.bf16.gmra.mrb[52].mxu0 %v1318_v59  ;;  %v1250_v13 = vmul.f32 %v1174_v36, %v3461_v61 }
 0x1b7   : > { %v1176_v43 = vadd.f32 1.0, %v2546_v63  ;;  %2559 = verf.f32 %v1033_v3  ;;  %v1037_v31 = vmul.f32 0.70710677, %v875_v14  ;;  %1771 = vmatmul.mubr.bf16.gmra.mrb[52].mxu1 %v1320_v11  ;;  %v1178_v55 = vadd.f32 1.0, %v2548_v40 }
 0x1b8   : > { %v2550_v4 = vpop.eup %2549  ;;  %v3536_v29 = vmul.f32 0.5, %v742_v27  ;;  %2561 = verf.f32 %v1032_v35  ;;  %v746_v57 = vadd.f32 %v3328_v1, %v3071_v20  ;;  %v3541_v5 = vmul.f32 %v1175_v2, %v3463_v38 }
 0x1b9   : > { %v2552_v41 = vpop.eup %2551  ;;  %v1179_v49 = vadd.f32 1.0, %v2550_v4  ;;  %2563 = verf.f32 %v1034_v60  ;;  %v877_v22 = vadd.f32 %v3330_v34, %v3073_v23  ;;  %v3546_v45 = vmul.f32 %v1177_v16, %v3484_v44 }
 0x1ba   : > { %v2554_v61 = vpop.eup %2553  ;;  %v1181_v53 = vadd.f32 1.0, %v2552_v41  ;;  %2565 = verf.f32 %v1035_v28  ;;  %v750_v27 = vadd.f32 %v3357_v39, %v3067_v18  ;;  %v3551_v1 = vmul.f32 %v1176_v43, %v3487_v7 }
 0x1bb   : > { %v2556_v15 = vpop.eup %2555  ;;  %v3553_v38 = vmul.f32 0.5, %v873_v42  ;;  %2567 = verf.f32 %v1037_v31  ;;  %v881_v36 = vadd.f32 %v3363_v25, %v3069_v19  ;;  %v3558_v34 = vmul.f32 %v1178_v55, %v3490_v30 }
 0x1bc   : > { %v3560_v16 = vmul.f32 0.5, %v744_v46  ;;  %v1036_v44 = vmul.f32 0.70710677, %v746_v57  ;;  %v752_v3 = vadd.f32 %v3365_v62, %v3071_v20  ;;  %v3565_v39 = vmul.f32 %v1179_v49, %v3498_v32 }
 0x1bd   : > { %v1180_v43 = vadd.f32 1.0, %v2554_v61  ;;  %v3567_v7 = vmul.f32 0.5, %v875_v14  ;;  %v1038_v42 = vmul.f32 0.70710677, %v877_v22  ;;  %v3570_v63 = vmul.f32 %v1181_v53, %v3502_v33 }
 0x1be   : > { %v1182_v25 = vadd.f32 1.0, %v2556_v15  ;;  %v3572_v35 = vmul.f32 0.5, %v746_v57  ;;  %v1039_v30 = vmul.f32 0.70710677, %v750_v27  ;;  %v1041_v59 = vmul.f32 0.70710677, %v881_v36 }
 0x1bf   : > { %v2558_v46 = vpop.eup %2557  ;;  %v883_v40 = vadd.f32 %v3369_v0, %v3073_v23  ;;  %v1323_v62 = vpack.c.bf16 %v1248_v6, %v3493_v48  ;;  %v1325_v32 = vpack.c.bf16 %v1250_v13, %v3496_v54  ;;  %2569 = verf.f32 %v1036_v44 }
 0x1c0   : > { %v1040_v14 = vmul.f32 0.70710677, %v752_v3  ;;  %v754_v2 = vadd.f32 %v3371_v26, %v3067_v18  ;;  %v885_v33 = vadd.f32 %v3375_v8, %v3069_v19  ;;  %v3582_v11 = vmul.f32 0.5, %v877_v22 }
 0x1c1   : > { %v2560_v60 = vpop.eup %2559  ;;  %2571 = verf.f32 %v1038_v42  ;;  %v1042_v4 = vmul.f32 0.70710677, %v883_v40  ;;  %1666 = vmatprep.mubr.bf16.mxu0 %v1323_v62  ;;  %1778 = vmatprep.mubr.bf16.mxu1 %v1325_v32  ;;  %v1322_v0 = vpack.c.bf16 %v3509_v47, %v3468_v51  ;;  %v1256_v54 = vmul.f32 %v1180_v43, %v3504_v58 }
 0x1c2   : > { %v2562_v48 = vpop.eup %2561  ;;  %v1183_v6 = vadd.f32 1.0, %v2558_v46  ;;  %2573 = verf.f32 %v1039_v30  ;;  %v1043_v28 = vmul.f32 0.70710677, %v754_v2  ;;  %v1258_v41 = vmul.f32 %v1182_v25, %v3520_v24 }
 0x1c3   : > { %v2564_v26 = vpop.eup %2563  ;;  %v3588_v8 = vmul.f32 0.5, %v750_v27  ;;  %2575 = verf.f32 %v1041_v59  ;;  %v1045_v13 = vmul.f32 0.70710677, %v885_v33  ;;  %1667 = vmatmul.mubr.bf16.gmra.mrb[56].mxu0 %v1322_v0  ;;  %v1185_v55 = vadd.f32 1.0, %v2560_v60 }
 0x1c4   : > { %v2566_v31 = vpop.eup %2565  ;;  %2577 = verf.f32 %v1040_v14  ;;  %v1324_v51 = vpack.c.bf16 %v3512_v10, %v3481_v17  ;;  %v756_v58 = vadd.f32 %v3377_v21, %v3071_v20  ;;  %v1184_v57 = vadd.f32 1.0, %v2562_v48  ;;  %v3858_v17 = vld [vmem:[#allocation18_spill] sm:$0xff] }
 0x1c5   : > { %v2568_v47 = vpop.eup %2567  ;;  %2579 = verf.f32 %v1042_v4  ;;  %v887_v24 = vadd.f32 %v3391_v56, %v3073_v23  ;;  %v760_v49 = vadd.f32 %v3423_v37, %v3067_v18  ;;  %v3599_v22 = vmul.f32 %v1183_v6, %v3524_v12 }
 0x1c6   : > { %2581 = verf.f32 %v1043_v28  ;;  %1779 = vmatmul.mubr.bf16.gmra.mrb[56].mxu1 %v1324_v51  ;;  %v1044_v61 = vmul.f32 0.70710677, %v756_v58  ;;  %v3603_v10 = vadd.f32 %v3858_v17, %v3069_v19  ;;  %v1186_v21 = vadd.f32 1.0, %v2564_v26 }
 0x1c7   : > { %v3605_v53 = vmul.f32 0.5, %v881_v36  ;;  %2583 = verf.f32 %v1045_v13  ;;  %v1046_v27 = vmul.f32 0.70710677, %v887_v24  ;;  %v3608_v56 = vmul.f32 %v1185_v55, %v3533_v9  ;;  %v3859_v9 = vld [vmem:[#allocation19_spill] sm:$0xff] }
 0x1c8   : > { %v1187_v15 = vadd.f32 1.0, %v2566_v31  ;;  %v1189_v37 = vadd.f32 1.0, %v2568_v47  ;;  %2585 = verf.f32 %v1044_v61  ;;  %v3611_v12 = vmul.f32 %v1184_v57, %v3536_v29 }
 0x1c9   : > { %v3613_v44 = vmul.f32 0.5, %v752_v3  ;;  %2587 = verf.f32 %v1046_v27  ;;  %v1047_v43 = vmul.f32 0.70710677, %v760_v49  ;;  %v2570_v42 = vpop.eup %2569  ;;  %v3615_v25 = vmul.f32 0.5, %v883_v40  ;;  %v3860_v3 = vld [vmem:[#allocation20_spill] sm:$0xff] }
 0x1ca   : > { %v3617_v36 = vmul.f32 0.5, %v754_v2  ;;  %v1049_v30 = vmul.f32 0.70710677, %v3603_v10  ;;  %v3622_v46 = vadd.f32 %v3859_v9, %v3071_v20  ;;  %v3625_v62 = vmul.f32 %v1186_v21, %v3553_v38 }
 0x1cb   : > { %v2572_v59 = vpop.eup %2571  ;;  %v3627_v29 = vmul.f32 0.5, %v885_v33  ;;  %v3631_v32 = vadd.f32 %v3860_v3, %v3073_v23  ;;  %v1327_v40 = vpack.c.bf16 %v1256_v54, %v3551_v1  ;;  %v3635_v2 = vmul.f32 %v1187_v15, %v3560_v16  ;;  %v3861_v16 = vld [vmem:[#allocation21_spill] sm:$0xff] }
 0x1cc   : > { %v2574_v14 = vpop.eup %2573  ;;  %v3638_v60 = vmul.f32 %v1189_v37, %v3567_v7  ;;  %v1048_v4 = vmul.f32 0.70710677, %v3622_v46  ;;  %v1329_v38 = vpack.c.bf16 %v1258_v41, %v3558_v34  ;;  %v1188_v33 = vadd.f32 1.0, %v2570_v42 }
 0x1cd   : > { %v2576_v0 = vpop.eup %2575  ;;  %2589 = verf.f32 %v1047_v43  ;;  %v1050_v48 = vmul.f32 0.70710677, %v3631_v32  ;;  %1674 = vmatprep.mubr.bf16.mxu0 %v1327_v40  ;;  %v764_v1 = vadd.f32 %v3437_v52, %v3067_v18  ;;  %v968_v6 = vmul.f32 0.5, %v756_v58 }
 0x1ce   : > { %v2578_v54 = vpop.eup %2577  ;;  %2591 = verf.f32 %v1049_v30  ;;  %1786 = vmatprep.mubr.bf16.mxu1 %v1329_v38  ;;  %v3647_v7 = vadd.f32 %v3861_v16, %v3069_v19  ;;  %v1326_v34 = vpack.c.bf16 %v3565_v39, %v3541_v5  ;;  %v1190_v26 = vadd.f32 1.0, %v2572_v59  ;;  %v3862_v39 = vld [vmem:[#allocation22_spill] sm:$0xff] }
 0x1cf   : > { %v2580_v28 = vpop.eup %2579  ;;  %v970_v41 = vmul.f32 0.5, %v887_v24  ;;  %2593 = verf.f32 %v1048_v4  ;;  %v1051_v13 = vmul.f32 0.70710677, %v764_v1  ;;  %v1191_v55 = vadd.f32 1.0, %v2574_v14 }
 0x1d0   : > { %v2582_v31 = vpop.eup %2581  ;;  %v3651_v51 = vmul.f32 0.5, %v760_v49  ;;  %2595 = verf.f32 %v1050_v48  ;;  %v1053_v52 = vmul.f32 0.70710677, %v3647_v7  ;;  %1675 = vmatmul.mubr.bf16.gmra.mrb[60].mxu0 %v1326_v34  ;;  %v1264_v47 = vmul.f32 %v1188_v33, %v3572_v35  ;;  %v3863_v49 = vld [vmem:[#allocation23_spill] sm:$0xff]  ;;  %v3865_v33 = vld [vmem:[#allocation25_spill] sm:$0xff] }
 0x1d1   : > { %v2584_v58 = vpop.eup %2583  ;;  %2597 = verf.f32 %v1051_v13  ;;  %v1328_v5 = vpack.c.bf16 %v3570_v63, %v3546_v45  ;;  %v3659_v57 = vadd.f32 %v3862_v39, %v3071_v20  ;;  %v1193_v61 = vadd.f32 1.0, %v2576_v0 }
 0x1d2   : > { %v2586_v24 = vpop.eup %2585  ;;  %v1192_v17 = vadd.f32 1.0, %v2578_v54  ;;  %2599 = verf.f32 %v1053_v52  ;;  %v3663_v21 = vadd.f32 %v3863_v49, %v3073_v23  ;;  %v1266_v15 = vmul.f32 %v1190_v26, %v3582_v11 }
 0x1d3   : > { %v2588_v27 = vpop.eup %2587  ;;  %v1194_v35 = vadd.f32 1.0, %v2580_v28  ;;  %v1196_v37 = vadd.f32 1.0, %v2586_v24  ;;  %1787 = vmatmul.mubr.bf16.gmra.mrb[60].mxu1 %v1328_v5  ;;  %v1052_v45 = vmul.f32 0.70710677, %v3659_v57  ;;  %v3668_v63 = vmul.f32 %v1191_v55, %v3588_v8  ;;  %v3864_v8 = vld [vmem:[#allocation24_spill] sm:$0xff] }
 0x1d4   : > { %v1198_v43 = vadd.f32 1.0, %v2588_v27  ;;  %v973_v42 = vmul.f32 0.5, %v3603_v10  ;;  %v1054_v30 = vmul.f32 0.70710677, %v3663_v21  ;;  %v1195_v9 = vadd.f32 1.0, %v2582_v31 }
 0x1d5   : > { %v1197_v59 = vadd.f32 1.0, %v2584_v58  ;;  %2601 = verf.f32 %v1052_v45  ;;  %v3674_v3 = vadd.f32 %v3470_v50, %v3067_v18  ;;  %v3677_v11 = vmul.f32 %v1193_v61, %v3605_v53  ;;  %v3866_v53 = vld [vmem:[#allocation26_spill] sm:$0xff] }
 0x1d6   : > { %v1268_v40 = vmul.f32 %v1192_v17, %v3613_v44  ;;  %2603 = verf.f32 %v1054_v30  ;;  %v3682_v14 = vadd.f32 %v3864_v8, %v3069_v19  ;;  %v1270_v4 = vmul.f32 %v1194_v35, %v3615_v25 }
 0x1d7   : > { %v2590_v10 = vpop.eup %2589  ;;  %v1272_v38 = vmul.f32 %v1196_v37, %v968_v6  ;;  %v975_v0 = vmul.f32 0.5, %v764_v1  ;;  %v772_v48 = vadd.f32 %v3865_v33, %v3071_v20  ;;  %v1274_v50 = vmul.f32 %v1198_v43, %v970_v41 }
 0x1d8   : > { %v2592_v18 = vpop.eup %2591  ;;  %v3689_v54 = vadd.f32 %v3866_v53, %v3073_v23  ;;  %v1331_v44 = vpack.c.bf16 %v1264_v47, %v3611_v12  ;;  %v1333_v16 = vpack.c.bf16 %v1266_v15, %v3625_v62  ;;  %v1271_v34 = vmul.f32 %v1195_v9, %v3617_v36 }
 0x1d9   : > { %v2594_v19 = vpop.eup %2593  ;;  %v1273_v25 = vmul.f32 %v1197_v59, %v3627_v29  ;;  %v1055_v1 = vmul.f32 0.70710677, %v3674_v3  ;;  %v1056_v6 = vmul.f32 0.70710677, %v772_v48  ;;  %v1199_v20 = vadd.f32 1.0, %v2590_v10 }
 0x1da   : > { %v2596_v28 = vpop.eup %2595  ;;  %v1057_v26 = vmul.f32 0.70710677, %v3682_v14  ;;  %v1058_v41 = vmul.f32 0.70710677, %v3689_v54  ;;  %1682 = vmatprep.mubr.bf16.mxu0 %v1331_v44  ;;  %1794 = vmatprep.mubr.bf16.mxu1 %v1333_v16  ;;  %v1330_v23 = vpack.c.bf16 %v3635_v2, %v3599_v22  ;;  %v1201_v62 = vadd.f32 1.0, %v2592_v18 }
 0x1db   : > { %v2598_v12 = vpop.eup %2597  ;;  %2605 = verf.f32 %v1056_v6  ;;  %v1332_v36 = vpack.c.bf16 %v3638_v60, %v3608_v56  ;;  %v1335_v29 = vpack.c.bf16 %v1272_v38, %v1268_v40  ;;  %v977_v55 = vmul.f32 0.5, %v3647_v7 }
 0x1dc   : > { %v2600_v13 = vpop.eup %2599  ;;  %v1203_v31 = vadd.f32 1.0, %v2598_v12  ;;  %2607 = verf.f32 %v1058_v41  ;;  %1683 = vmatmul.mubr.bf16.gmra.mrb[64].mxu0 %v1330_v23  ;;  %v1337_v52 = vpack.c.bf16 %v1274_v50, %v1270_v4  ;;  %v1334_v22 = vpack.c.bf16 %v1271_v34, %v3668_v63 }
 0x1dd   : > { %v1205_v58 = vadd.f32 1.0, %v2600_v13  ;;  %2609 = verf.f32 %v1055_v1  ;;  %1795 = vmatmul.mubr.bf16.gmra.mrb[64].mxu1 %v1332_v36  ;;  %1690 = vmatprep.mubr.bf16.mxu0 %v1335_v29  ;;  %v1336_v2 = vpack.c.bf16 %v1273_v25, %v3677_v11  ;;  %v1275_v47 = vmul.f32 %v1199_v20, %v3651_v51 }
 0x1de   : > { %v1200_v5 = vadd.f32 1.0, %v2594_v19  ;;  %v1279_v56 = vmul.f32 %v1203_v31, %v975_v0  ;;  %2611 = verf.f32 %v1057_v26  ;;  %1802 = vmatprep.mubr.bf16.mxu1 %v1337_v52  ;;  %v1277_v39 = vmul.f32 %v1201_v62, %v973_v42 }
 0x1df   : > { %v2602_v60 = vpop.eup %2601  ;;  %v1202_v7 = vadd.f32 1.0, %v2596_v28  ;;  %v1281_v24 = vmul.f32 %v1205_v58, %v977_v55  ;;  %v972_v17 = vmul.f32 0.5, %v3622_v46  ;;  %v976_v49 = vmul.f32 0.5, %v3659_v57 }
 0x1e0   : > { %v2604_v61 = vpop.eup %2603  ;;  %v1204_v27 = vadd.f32 1.0, %v2602_v60  ;;  %v1338_v15 = vpack.c.bf16 %v1279_v56, %v1275_v47  ;;  %v974_v35 = vmul.f32 0.5, %v3631_v32  ;;  %v978_v37 = vmul.f32 0.5, %v3663_v21 }
 0x1e1   : > { %v1206_v51 = vadd.f32 1.0, %v2604_v61  ;;  %v1340_v45 = vpack.c.bf16 %v1281_v24, %v1277_v39  ;;  %v1276_v63 = vmul.f32 %v1200_v5, %v972_v17  ;;  %v980_v40 = vmul.f32 0.5, %v772_v48 }
 0x1e2   : > { %v1280_v43 = vmul.f32 %v1204_v27, %v976_v49  ;;  %v1278_v30 = vmul.f32 %v1202_v7, %v974_v35  ;;  %v982_v32 = vmul.f32 0.5, %v3689_v54  ;;  %v979_v53 = vmul.f32 0.5, %v3674_v3 }
 0x1e3   : > { %v1282_v9 = vmul.f32 %v1206_v51, %v978_v37  ;;  %v981_v48 = vmul.f32 0.5, %v3682_v14  ;;  %v3717_v14 = vld [vmem:[%s3819_s4] ss:$0 sm:$0xff] }
 0x1e4   : > { %1691 = vmatmul.mubr.bf16.gmra.mrb[68].mxu0 %v1334_v22  ;;  %v1339_v42 = vpack.c.bf16 %v1280_v43, %v1276_v63 }
 0x1e5   : > { %v2606_v59 = vpop.eup %2605  ;;  %1803 = vmatmul.mubr.bf16.gmra.mrb[68].mxu1 %v1336_v2  ;;  %v1341_v11 = vpack.c.bf16 %v1282_v9, %v1278_v30 }
 0x1e6   : > { %v2608_v46 = vpop.eup %2607  ;;  %v1208_v57 = vadd.f32 1.0, %v2606_v59  ;;  %1698 = vmatprep.mubr.bf16.mxu0 %v1339_v42 }
 0x1e7   : > { %v2610_v8 = vpop.eup %2609  ;;  %v1210_v10 = vadd.f32 1.0, %v2608_v46  ;;  %1810 = vmatprep.mubr.bf16.mxu1 %v1341_v11 }
 0x1e8   : > { %v2612_v21 = vpop.eup %2611  ;;  %v1284_v4 = vmul.f32 %v1208_v57, %v980_v40  ;;  %v1207_v0 = vadd.f32 1.0, %v2610_v8 }
 0x1e9   : > { %v1286_v38 = vmul.f32 %v1210_v10, %v982_v32  ;;  %v1209_v18 = vadd.f32 1.0, %v2612_v21 }
 0x1ea   : > { %v1343_v33 = vpack.c.bf16 %v1284_v4, %v1284_v4  ;;  %v1283_v44 = vmul.f32 %v1207_v0, %v979_v53 }
 0x1eb   : > { %v1345_v50 = vpack.c.bf16 %v1286_v38, %v1286_v38  ;;  %v1285_v54 = vmul.f32 %v1209_v18, %v981_v48 }
 0x1ec   : > { %1699 = vmatmul.mubr.bf16.gmra.mrb[72].mxu0 %v1338_v15  ;;  %v1342_v16 = vpack.c.bf16 %v1283_v44, %v1283_v44 }
 0x1ed   : > { %1811 = vmatmul.mubr.bf16.gmra.mrb[72].mxu1 %v1340_v45  ;;  %1706 = vmatprep.mubr.bf16.mxu0 %v1343_v33  ;;  %v1344_v19 = vpack.c.bf16 %v1285_v54, %v1285_v54 }
 0x1ee   : > { %1818 = vmatprep.mubr.bf16.mxu1 %v1345_v50 }
 0x1f4   : > { %1707 = vmatmul.mubr.bf16.gmra.mrb[76].mxu0 %v1342_v16 }
 0x1f5   : > { %1819 = vmatmul.mubr.bf16.gmra.mrb[76].mxu1 %v1344_v19 }
 0x25c   : > { %v2142_v34 = vpop.f32.mrb[40].mxu0 }
 0x25d   : > { %v2218_v25 = vpop.f32.mrb[40].mxu1  ;;  %v2143_v1 = vpop.f32.mrb[41].mxu0 }
 0x25e   : > { %v2219_v6 = vpop.f32.mrb[41].mxu1  ;;  %v2144_v28 = vadd.f32 %v2143_v1, %v2142_v34  ;;  %v2145_v3 = vpop.f32.mrb[42].mxu0 }
 0x25f   : > { %v2220_v20 = vadd.f32 %v2219_v6, %v2218_v25  ;;  %v2221_v26 = vpop.f32.mrb[42].mxu1  ;;  %v2146_v41 = vpop.f32.mrb[43].mxu0 }
 0x260   : > { %v2222_v23 = vpop.f32.mrb[43].mxu1  ;;  %v2147_v62 = vadd.f32 %v2146_v41, %v2145_v3 }
 0x261   : > { %v1749_v12 = vadd.f32 %v2220_v20, %v2144_v28  ;;  %v2223_v36 = vadd.f32 %v2222_v23, %v2221_v26 }
 0x263   : > { %v1826_v29 = vadd.f32 %v3717_v14, %v1749_v12  ;;  %v1752_v13 = vadd.f32 %v2223_v36, %v2147_v62 }
 0x265   : > { %1886 = vst [vmem:[%s3720_s9] sm:$0xff] %v1826_v29  ;;  %v1827_v31 = vadd.f32 %v3717_v14, %v1752_v13 }
 0x267   : > { %1887 = vst [vmem:[%s3720_s9 + $0x8] sm:$0xff] %v1827_v31 }
 0x26d   : > { %v2224_v52 = vpop.f32.mrb[44].mxu1 }
 0x26e   : > { %v2225_v22 = vpop.f32.mrb[45].mxu1 }
 0x26f   : > { %v2226_v47 = vadd.f32 %v2225_v22, %v2224_v52  ;;  %v2227_v56 = vpop.f32.mrb[46].mxu1 }
 0x270   : > { %v2148_v55 = vpop.f32.mrb[44].mxu0  ;;  %v2228_v39 = vpop.f32.mrb[47].mxu1 }
 0x271   : > { %v2149_v58 = vpop.f32.mrb[45].mxu0  ;;  %v2229_v61 = vadd.f32 %v2228_v39, %v2227_v56 }
 0x272   : > { %v2150_v2 = vadd.f32 %v2149_v58, %v2148_v55  ;;  %v2151_v5 = vpop.f32.mrb[46].mxu0 }
 0x273   : > { %v2152_v60 = vpop.f32.mrb[47].mxu0 }
 0x274   : > { %v1757_v7 = vadd.f32 %v2226_v47, %v2150_v2  ;;  %v2153_v24 = vadd.f32 %v2152_v60, %v2151_v5 }
 0x276   : > { %v1828_v17 = vadd.f32 %v3717_v14, %v1757_v7  ;;  %v1760_v49 = vadd.f32 %v2229_v61, %v2153_v24 }
 0x278   : > { %1888 = vst [vmem:[%s3720_s9 + $0x10] sm:$0xff] %v1828_v17  ;;  %v1829_v27 = vadd.f32 %v3717_v14, %v1760_v49 }
 0x27a   : > { %1889 = vst [vmem:[%s3720_s9 + $0x18] sm:$0xff] %v1829_v27 }
 0x27b   : > { %v2154_v15 = vpop.f32.mrb[48].mxu0 }
 0x27c   : > { %v2155_v37 = vpop.f32.mrb[49].mxu0 }
 0x27d   : > { %v2156_v45 = vadd.f32 %v2155_v37, %v2154_v15  ;;  %v2157_v43 = vpop.f32.mrb[50].mxu0 }
 0x27e   : > { %v2158_v9 = vpop.f32.mrb[51].mxu0 }
 0x27f   : > { %v2230_v35 = vpop.f32.mrb[48].mxu1  ;;  %v2159_v11 = vadd.f32 %v2158_v9, %v2157_v43 }
 0x280   : > { %v2231_v51 = vpop.f32.mrb[49].mxu1 }
 0x281   : > { %v2232_v63 = vadd.f32 %v2231_v51, %v2230_v35  ;;  %v2233_v30 = vpop.f32.mrb[50].mxu1 }
 0x282   : > { %v2234_v42 = vpop.f32.mrb[51].mxu1 }
 0x283   : > { %v1765_v59 = vadd.f32 %v2232_v63, %v2156_v45  ;;  %v2235_v46 = vadd.f32 %v2234_v42, %v2233_v30 }
 0x285   : > { %v1830_v40 = vadd.f32 %v3717_v14, %v1765_v59  ;;  %v1768_v57 = vadd.f32 %v2235_v46, %v2159_v11 }
 0x287   : > { %1890 = vst [vmem:[%s3720_s9 + $0x20] sm:$0xff] %v1830_v40  ;;  %v1831_v8 = vadd.f32 %v3717_v14, %v1768_v57 }
 0x289   : > { %1891 = vst [vmem:[%s3720_s9 + $0x28] sm:$0xff] %v1831_v8  ;;  %v2160_v32 = vpop.f32.mrb[52].mxu0 }
 0x28a   : > { %v2236_v10 = vpop.f32.mrb[52].mxu1  ;;  %v2161_v21 = vpop.f32.mrb[53].mxu0 }
 0x28b   : > { %v2162_v4 = vadd.f32 %v2161_v21, %v2160_v32  ;;  %v2237_v38 = vpop.f32.mrb[53].mxu1  ;;  %v2163_v0 = vpop.f32.mrb[54].mxu0 }
 0x28c   : > { %v2238_v33 = vadd.f32 %v2237_v38, %v2236_v10  ;;  %v2239_v18 = vpop.f32.mrb[54].mxu1  ;;  %v2164_v50 = vpop.f32.mrb[55].mxu0 }
 0x28d   : > { %v2165_v53 = vadd.f32 %v2164_v50, %v2163_v0  ;;  %v2240_v48 = vpop.f32.mrb[55].mxu1 }
 0x28e   : > { %v1773_v44 = vadd.f32 %v2238_v33, %v2162_v4  ;;  %v2241_v54 = vadd.f32 %v2240_v48, %v2239_v18 }
 0x290   : > { %v1832_v16 = vadd.f32 %v3717_v14, %v1773_v44  ;;  %v1776_v19 = vadd.f32 %v2241_v54, %v2165_v53 }
 0x292   : > { %1892 = vst [vmem:[%s3720_s9 + $0x30] sm:$0xff] %v1832_v16  ;;  %v1833_v34 = vadd.f32 %v3717_v14, %v1776_v19 }
 0x294   : > { %1893 = vst [vmem:[%s3720_s9 + $0x38] sm:$0xff] %v1833_v34 }
 0x296   : > { %v2166_v25 = vpop.f32.mrb[56].mxu0 }
 0x297   : > { %v2167_v1 = vpop.f32.mrb[57].mxu0 }
 0x298   : > { %v2168_v6 = vadd.f32 %v2167_v1, %v2166_v25  ;;  %v2169_v28 = vpop.f32.mrb[58].mxu0 }
 0x299   : > { %v2242_v20 = vpop.f32.mrb[56].mxu1  ;;  %v2170_v3 = vpop.f32.mrb[59].mxu0 }
 0x29a   : > { %v2243_v26 = vpop.f32.mrb[57].mxu1  ;;  %v2171_v41 = vadd.f32 %v2170_v3, %v2169_v28 }
 0x29b   : > { %v2244_v23 = vadd.f32 %v2243_v26, %v2242_v20  ;;  %v2245_v12 = vpop.f32.mrb[58].mxu1 }
 0x29c   : > { %v2246_v62 = vpop.f32.mrb[59].mxu1 }
 0x29d   : > { %v1781_v36 = vadd.f32 %v2244_v23, %v2168_v6  ;;  %v2247_v29 = vadd.f32 %v2246_v62, %v2245_v12 }
 0x29f   : > { %v1834_v13 = vadd.f32 %v3717_v14, %v1781_v36  ;;  %v1784_v31 = vadd.f32 %v2247_v29, %v2171_v41 }
 0x2a1   : > { %1894 = vst [vmem:[%s3720_s9 + $0x40] sm:$0xff] %v1834_v13  ;;  %v1835_v55 = vadd.f32 %v3717_v14, %v1784_v31 }
 0x2a3   : > { %1895 = vst [vmem:[%s3720_s9 + $0x48] sm:$0xff] %v1835_v55  ;;  %v2172_v52 = vpop.f32.mrb[60].mxu0 }
 0x2a4   : > { %v2173_v58 = vpop.f32.mrb[61].mxu0 }
 0x2a5   : > { %v2174_v22 = vadd.f32 %v2173_v58, %v2172_v52  ;;  %v2175_v2 = vpop.f32.mrb[62].mxu0 }
 0x2a6   : > { %v2248_v47 = vpop.f32.mrb[60].mxu1  ;;  %v2176_v5 = vpop.f32.mrb[63].mxu0 }
 0x2a7   : > { %v2249_v56 = vpop.f32.mrb[61].mxu1  ;;  %v2177_v60 = vadd.f32 %v2176_v5, %v2175_v2 }
 0x2a8   : > { %v2250_v39 = vadd.f32 %v2249_v56, %v2248_v47  ;;  %v2251_v7 = vpop.f32.mrb[62].mxu1 }
 0x2a9   : > { %v2252_v24 = vpop.f32.mrb[63].mxu1 }
 0x2aa   : > { %v1789_v61 = vadd.f32 %v2250_v39, %v2174_v22  ;;  %v2253_v17 = vadd.f32 %v2252_v24, %v2251_v7 }
 0x2ac   : > { %v1836_v49 = vadd.f32 %v3717_v14, %v1789_v61  ;;  %v1792_v27 = vadd.f32 %v2253_v17, %v2177_v60 }
 0x2ae   : > { %1896 = vst [vmem:[%s3720_s9 + $0x50] sm:$0xff] %v1836_v49  ;;  %v1837_v15 = vadd.f32 %v3717_v14, %v1792_v27 }
 0x2af   : > { %v2178_v35 = vpop.f32.mrb[64].mxu0 }
 0x2b0   : > { %1897 = vst [vmem:[%s3720_s9 + $0x58] sm:$0xff] %v1837_v15  ;;  %v2254_v37 = vpop.f32.mrb[64].mxu1  ;;  %v2179_v51 = vpop.f32.mrb[65].mxu0 }
 0x2b1   : > { %v2180_v45 = vadd.f32 %v2179_v51, %v2178_v35  ;;  %v2255_v63 = vpop.f32.mrb[65].mxu1  ;;  %v2181_v43 = vpop.f32.mrb[66].mxu0 }
 0x2b2   : > { %v2256_v30 = vadd.f32 %v2255_v63, %v2254_v37  ;;  %v2257_v9 = vpop.f32.mrb[66].mxu1  ;;  %v2182_v42 = vpop.f32.mrb[67].mxu0 }
 0x2b3   : > { %v2183_v59 = vadd.f32 %v2182_v42, %v2181_v43  ;;  %v2258_v11 = vpop.f32.mrb[67].mxu1 }
 0x2b4   : > { %v1797_v46 = vadd.f32 %v2256_v30, %v2180_v45  ;;  %v2259_v40 = vadd.f32 %v2258_v11, %v2257_v9 }
 0x2b6   : > { %v1838_v57 = vadd.f32 %v3717_v14, %v1797_v46  ;;  %v1800_v8 = vadd.f32 %v2259_v40, %v2183_v59 }
 0x2b7   : > { %v2184_v32 = vpop.f32.mrb[68].mxu0 }
 0x2b8   : > { %1898 = vst [vmem:[%s3720_s9 + $0x60] sm:$0xff] %v1838_v57  ;;  %v1839_v10 = vadd.f32 %v3717_v14, %v1800_v8  ;;  %v2260_v21 = vpop.f32.mrb[68].mxu1  ;;  %v2185_v4 = vpop.f32.mrb[69].mxu0 }
 0x2b9   : > { %v2186_v38 = vadd.f32 %v2185_v4, %v2184_v32  ;;  %v2261_v0 = vpop.f32.mrb[69].mxu1  ;;  %v2187_v33 = vpop.f32.mrb[70].mxu0 }
 0x2ba   : > { %1899 = vst [vmem:[%s3720_s9 + $0x68] sm:$0xff] %v1839_v10  ;;  %v2262_v18 = vadd.f32 %v2261_v0, %v2260_v21  ;;  %v2263_v50 = vpop.f32.mrb[70].mxu1  ;;  %v2188_v53 = vpop.f32.mrb[71].mxu0 }
 0x2bb   : > { %v2189_v48 = vadd.f32 %v2188_v53, %v2187_v33  ;;  %v2264_v44 = vpop.f32.mrb[71].mxu1 }
 0x2bc   : > { %v1805_v54 = vadd.f32 %v2262_v18, %v2186_v38  ;;  %v2265_v16 = vadd.f32 %v2264_v44, %v2263_v50 }
 0x2be   : > { %v1840_v19 = vadd.f32 %v3717_v14, %v1805_v54  ;;  %v1808_v34 = vadd.f32 %v2265_v16, %v2189_v48 }
 0x2bf   : > { %v2190_v25 = vpop.f32.mrb[72].mxu0 }
 0x2c0   : > { %1900 = vst [vmem:[%s3720_s9 + $0x70] sm:$0xff] %v1840_v19  ;;  %v1841_v1 = vadd.f32 %v3717_v14, %v1808_v34  ;;  %v2266_v6 = vpop.f32.mrb[72].mxu1  ;;  %v2191_v28 = vpop.f32.mrb[73].mxu0 }
 0x2c1   : > { %v2192_v20 = vadd.f32 %v2191_v28, %v2190_v25  ;;  %v2267_v3 = vpop.f32.mrb[73].mxu1  ;;  %v2193_v26 = vpop.f32.mrb[74].mxu0 }
 0x2c2   : > { %1901 = vst [vmem:[%s3720_s9 + $0x78] sm:$0xff] %v1841_v1  ;;  %v2268_v41 = vadd.f32 %v2267_v3, %v2266_v6  ;;  %v2269_v23 = vpop.f32.mrb[74].mxu1  ;;  %v2194_v12 = vpop.f32.mrb[75].mxu0 }
 0x2c3   : > { %v2195_v62 = vadd.f32 %v2194_v12, %v2193_v26  ;;  %v2270_v36 = vpop.f32.mrb[75].mxu1 }
 0x2c4   : > { %v1813_v29 = vadd.f32 %v2268_v41, %v2192_v20  ;;  %v2271_v13 = vadd.f32 %v2270_v36, %v2269_v23 }
 0x2c6   : > { %v1842_v31 = vadd.f32 %v3717_v14, %v1813_v29  ;;  %v1816_v55 = vadd.f32 %v2271_v13, %v2195_v62 }
 0x2c7   : > { %v2196_v52 = vpop.f32.mrb[76].mxu0 }
 0x2c8   : > { %1902 = vst [vmem:[%s3720_s9 + $0x80] sm:$0xff] %v1842_v31  ;;  %v1843_v58 = vadd.f32 %v3717_v14, %v1816_v55  ;;  %v2272_v22 = vpop.f32.mrb[76].mxu1  ;;  %v2197_v2 = vpop.f32.mrb[77].mxu0 }
 0x2c9   : > { %v2198_v47 = vadd.f32 %v2197_v2, %v2196_v52  ;;  %v2273_v5 = vpop.f32.mrb[77].mxu1  ;;  %v2199_v56 = vpop.f32.mrb[78].mxu0 }
 0x2ca   : > { %1903 = vst [vmem:[%s3720_s9 + $0x88] sm:$0xff] %v1843_v58  ;;  %v2274_v60 = vadd.f32 %v2273_v5, %v2272_v22  ;;  %v2275_v39 = vpop.f32.mrb[78].mxu1  ;;  %v2200_v7 = vpop.f32.mrb[79].mxu0 }
 0x2cb   : > { %v2276_v24 = vpop.f32.mrb[79].mxu1 }
 0x2cc   : > { %v1821_v61 = vadd.f32 %v2274_v60, %v2198_v47 }
 0x2ce   : > { %v1844_v17 = vadd.f32 %v3717_v14, %v1821_v61 }
 0x2d0   : > { %1904 = vst [vmem:[%s3720_s9 + $0x90] sm:$0xff] %v1844_v17 }
 0x2d1   : > { %2712 = shalt.err (!%p2709_p2)
}
 0x2d2   : > { %s2713_s28 = scalar_lea.hbm %s3762_s24, 2432  ;;  %s2717_s16 = scalar_lea.hbm %s3820_s5, 4864 }
 0x2d3   : > { %p2714_p0 = scmp.ne.s32.totalorder %s3762_s24, %s2713_s28  ;;  %p2718_p6 = scmp.lt.u32.totalorder %s3762_s24, %s3820_s5 }
 0x2d4   : > { %p2719_p7 = scmp.lt.u32.totalorder %s2717_s16, %s2713_s28  ;;  %p2721_p8 = scmp.lt.u32.totalorder %s2713_s28, %s3762_s24 }
 0x2d5   : > { %p2715_p4 = pnand %p2714_p0, %p3867_p12 }
 0x2d6   : > { %p2720_p11 = por %p2719_p7, %p2718_p6 }
 0x2d7   : > { %p2716_p13 = pneg %p2715_p4 }
 0x2d8   : > { %p2722_p1 = por %p2721_p8, %p2720_p11 }
 0x2da   : > { %p2723_p10 = pnand %p2722_p1, %p2716_p13 }
 0x2dc   : > { %2726 = shalt.err (!%p2723_p10)
}
 0x2dd   : > { %s2796_s10 = smov 128   ;;  %s2797_s6 = smov 8  }
 0x2de   : > { %2291 = dma.vmem_to_hbm [thread:$0]  (%p3867_p12), %s3765_s13, 2432, %s3762_s24, %s1906_s21, %s2796_s10, %s2796_s10, %s2797_s6  }
 0x2df PF: > { %s1934_s27 = sand.u32 1, %s2765_s18   ;;  %p3868_p3 = scmp.ne.s32.totalorder %s3830_s29, 0 }
 0x2e0   : > { %p3869_p5 = scmp.ge.s32.totalorder %s2785_s23, 2  ;;  %s1935_s15 = scalar_lea.sflag [#allocation5], %s1934_s27 }
 0x2e2   : > { %p2305_p9 = pnand %p3869_p5, %p3868_p3 }
 0x2e4   : > { %2760 = dma.done.wait (!%p2305_p9), %s1935_s15, 2432  }
 0x2e5   : > { %2762 = vsyncadd (!%p2305_p9), %s1935_s15, 4294964864  ;;  %s22_s23 = sadd.s32 1, %s2785_s23   ;;  %s3870_s18 = smov %s2769_s19 }
 0x2e6   : > { %p19_p2 = scmp.ge.s32.totalorder %s22_s23, 4   ;;  %s3871_s19 = smov %s2773_s20 }
 0x2e7   : > { %s3872_s20 = smov %s2976_s17  ;;  %s3873_s21 = smov %s2781_s22 }
 0x2e8   : > { %s3874_s22 = smov %s3876_s12  ;;  %21 = sbr.rel (!%p19_p2) target bundleno = 7 (0x7), region = 106 }
 0x2ef   :  { %1940 = vsyncpa [#allocation4], 1 }
 0x2f0   :  { %1942 = vsyncpa [#allocation4 + $0x1], 1 }
 0x2f1   :  { %1943 = vsyncpa [#allocation7], 1 }
 0x2f2   :  { %1944 = vsyncpa [#allocation5], 1 }
 0x2f3   :  { %1946 = vsyncpa [#allocation5 + $0x1], 1 }

</bundles_post_ra>
